<compile_context>
chip_gen: v5e
topology: v5e:2x2
jax: 0.10.0
libtpu: 0.0.40
codegen_flags: <defaults>
</compile_context>

<pallas_src>
import functools
import inspect

import jax
import jax.numpy as jnp
from jax import lax
from jax.experimental import pallas as pl
from jax.experimental.pallas import tpu as pltpu

EPS = 1e-5
MAXNORM = 1.0 - EPS


def _energy_kernel(x_ref, w_ref, b_ref, out_ref, *, n_pad, out_pad):
    rows = x_ref.shape[0]                       # tile_b * n_pad
    tile_b = rows // n_pad
    emb = w_ref.shape[1]

    # ---- dense layer: cast the streamed f32 tile to bf16 on the VPU (x stays
    # f32 in HBM -> no separate XLA cast pass), MXU accumulates in f32. ----
    e = jnp.dot(x_ref[...].astype(jnp.bfloat16), w_ref[...],
                preferred_element_type=jnp.float32)
    e = e + b_ref[...]

    # ---- manifold.normalize: renorm rows with ||e|| > 1-eps onto the ball ---
    sumsq = jnp.sum(e * e, axis=-1, keepdims=True)              # (rows, 1)
    maxsq = MAXNORM * MAXNORM
    scale = jnp.where(sumsq > maxsq,
                      MAXNORM * lax.rsqrt(sumsq + 1e-30),       # EUP rsqrt
                      jnp.ones_like(sumsq))
    e = e * scale
    sq = jnp.minimum(sumsq, maxsq)              # post-renorm ||e||^2, reused

    # ---- Poincare distance via ||s-o||^2 = ||s||^2 + ||o||^2 - 2 s.o ----
    e3 = e.reshape(tile_b, n_pad, emb)          # n_pad % 8 == 0 -> aligned
    s = e3[:, 0:1, :]                           # source point per bundle
    cross = jnp.sum(e3 * s, axis=-1)            # (tile_b, n_pad)
    sq2 = sq.reshape(tile_b, n_pad)
    sq_s = sq2[:, 0:1]

    d2 = jnp.maximum(sq_s + sq2 - 2.0 * cross, 0.0)
    den_s = jnp.maximum(1.0 - sq_s, EPS)
    den_o = jnp.maximum(1.0 - sq2, EPS)
    u = 2.0 * d2 / (den_s * den_o)
    # arcosh(1 + u) = log1p(u + sqrt(u*(u+2)))  (stable as u -> 0; col 0 = self)
    dist = jnp.log1p(u + jnp.sqrt(u * (u + 2.0)))

    # ---- lane-dense, unmasked full-width store.  The zero pad is applied
    # after all transcendental math (one vreg-sized block); concatenate is used
    # because its Mosaic lowering is universally available. ----
    if out_pad > n_pad:
        dist = jnp.concatenate(
            [dist, jnp.zeros((tile_b, out_pad - n_pad), jnp.float32)], axis=-1)
    out_ref[...] = dist


def _vmem_budget_bytes():
    """~75% of physical VMEM: 48 MiB on v7x (64 MiB/TC), 96 MiB on v5e/v6e."""
    cap = 64 * 1024 * 1024
    try:
        cap = int(getattr(pltpu.get_tpu_info(), "vmem_capacity_bytes", cap))
    except Exception:  # interpret mode / older runtime
        pass
    return min((cap * 3) // 4, 96 * 1024 * 1024)


def _pick_tile_b(batch, n_pad, d_in, emb, out_pad, vmem_budget):
    """Byte-budget tile pick (not a fixed row cap).

    Per batch-element of a grid step: f32 x block (double-buffered) + its
    in-kernel bf16 copy + f32 activation/distance working set + f32 output
    block (double-buffered).  Resident weight/bias counted once, budget ~80%
    of the VMEM limit to leave compiler headroom.
    """
    bytes_per_b = (n_pad * d_in * 4 * 2        # x tile, double-buffered f32
                   + n_pad * d_in * 2          # bf16 cast of the x tile
                   + n_pad * emb * 4 * 2       # e (f32) + elementwise temps
                   + out_pad * 4 * 2)          # out tile, double-buffered f32
    resident = d_in * emb * 2 + emb * 4        # weight (bf16) + bias (f32)
    avail = max((vmem_budget * 4) // 5 - 2 * resident, 8 * bytes_per_b)
    cap = min(avail // bytes_per_b,            # byte-limited
              max(4096 // n_pad, 8))           # <= ~4096 rows / grid step
    # keep the grid >= 2 whenever the batch allows it (v7x: 2 TensorCores).
    if batch > 8:
        cap = min(cap, 8 * pl.cdiv(pl.cdiv(batch, 2), 8))
    return max(8 * (cap // 8), 8)


def _supports_pipeline_mode():
    if not hasattr(pl, "Buffered"):
        return False
    try:
        return "pipeline_mode" in inspect.signature(pl.BlockSpec).parameters
    except (TypeError, ValueError):
        return False


_HAS_PIPELINE_MODE = _supports_pipeline_mode()


def energy_function(x, w, b, tile_b=None):
    """x: (B, N, in_dim) f32, w: (in_dim, emb_dim), b: (emb_dim,) -> (B, N-1)."""
    batch, n_per_batch, d_in = x.shape
    emb = w.shape[1]
    if n_per_batch < 2:
        raise ValueError("EnergyFunction needs at least 1 target point (N >= 2).")

    # Pad the bundle dim to a multiple of 8 (sublane alignment of the in-kernel
    # reshape / source-row broadcast); lane-dense output width.
    n_pad = 8 * pl.cdiv(n_per_batch, 8)
    out_pad = 128 * pl.cdiv(n_pad, 128)

    vmem_budget = _vmem_budget_bytes()
    if tile_b is None:
        tile_b = _pick_tile_b(batch, n_pad, d_in, emb, out_pad, vmem_budget)
    assert tile_b > 0 and tile_b % 8 == 0, tile_b

    # No whole-batch fallback: pad the batch up to a multiple of tile_b.
    batch_pad = tile_b * pl.cdiv(batch, tile_b)
    if n_pad != n_per_batch or batch_pad != batch:
        x = jnp.pad(x, ((0, batch_pad - batch),
                        (0, n_pad - n_per_batch), (0, 0)))

    # x stays f32 in HBM; the bf16 cast happens inside the kernel.
    x2d = x.reshape(batch_pad * n_pad, d_in).astype(jnp.float32)
    w_bf = w.astype(jnp.bfloat16)
    b2d = b.reshape(1, emb).astype(jnp.float32)

    grid = batch_pad // tile_b
    kernel = functools.partial(_energy_kernel, n_pad=n_pad, out_pad=out_pad)

    rows_total = batch_pad * n_pad
    cost = pl.CostEstimate(
        flops=2 * rows_total * d_in * emb,
        transcendentals=3 * rows_total,
        bytes_accessed=(rows_total * d_in * 4 + d_in * emb * 2 + emb * 4
                        + batch_pad * out_pad * 4))

    # TODO(synk): add a K ("arbitrary") grid axis + f32 accumulator scratch when
    # in_dim is large enough that the x tile / weight dominates the VMEM budget.

    def _call(single_buffer_resident):
        resident_kwargs = (
            dict(pipeline_mode=pl.Buffered(1)) if single_buffer_resident else {})
        in_specs = [
            # streamed batch tile of the activations (f32)
            pl.BlockSpec((tile_b * n_pad, d_in), lambda i: (i, 0)),
            # weight / bias: constant block index -> fetched once, VMEM resident
            pl.BlockSpec((d_in, emb), lambda i: (0, 0), **resident_kwargs),
            pl.BlockSpec((1, emb), lambda i: (0, 0), **resident_kwargs),
        ]
        return pl.pallas_call(
            kernel,
            out_shape=jax.ShapeDtypeStruct((batch_pad, out_pad), jnp.float32),
            grid_spec=pltpu.PrefetchScalarGridSpec(
                num_scalar_prefetch=0,
                grid=(grid,),
                in_specs=in_specs,
                out_specs=pl.BlockSpec((tile_b, out_pad), lambda i: (i, 0)),
            ),
            compiler_params=pltpu.CompilerParams(
                dimension_semantics=("parallel",),   # shards batch grid on v7x
                vmem_limit_bytes=vmem_budget,
            ),
            cost_estimate=cost,
        )(x2d, w_bf, b2d)

    if _HAS_PIPELINE_MODE:
        try:
            out_padded = _call(True)
        except Exception:   # pipeline_mode not honored by this Mosaic build
            out_padded = _call(False)
    else:
        out_padded = _call(False)

    # drop batch padding, the self-distance column (0) and the lane padding
    return out_padded[:batch, 1:n_per_batch]


def _reference(x, w, b):
    """Pure-JAX reference mirroring the PyTorch forward (bf16 matmul inputs)."""
    xf = x.astype(jnp.bfloat16).astype(jnp.float32)
    wf = w.astype(jnp.bfloat16).astype(jnp.float32)
    e = jnp.einsum("bnd,de->bne", xf, wf) + b
    norm = jnp.linalg.norm(e, axis=-1, keepdims=True)
    e = jnp.where(norm > MAXNORM, e * (MAXNORM / (norm + 1e-30)), e)
    s = e[:, :1, :]
    o = e[:, 1:, :]
    d2 = jnp.sum((s - o) ** 2, axis=-1)
    den_s = jnp.maximum(1.0 - jnp.sum(s * s, axis=-1), EPS)
    den_o = jnp.maximum(1.0 - jnp.sum(o * o, axis=-1), EPS)
    u = 2.0 * d2 / (den_s * den_o)
    return jnp.log1p(u + jnp.sqrt(u * (u + 2.0)))


if __name__ == "__main__":
    # Small shapes: batch=16, N=8 points per example (1 source + 7 targets),
    # in_dim=16, emb_dim=32.  Auto tile_b=8 -> a 2-step batch grid.
    B, N, D_in, E = 16, 8, 16, 32

    key = jax.random.PRNGKey(0)
    kx, kw, kb = jax.random.split(key, 3)

    # torch.nn.Linear-style init: uniform(-1/sqrt(in_dim), 1/sqrt(in_dim)).
    bound = 1.0 / (D_in ** 0.5)
    w = jax.random.uniform(kw, (D_in, E), jnp.float32, -bound, bound)
    b = jax.random.uniform(kb, (E,), jnp.float32, -bound, bound)
    x = jax.random.normal(kx, (B, N, D_in), jnp.float32)

    out = jax.block_until_ready(energy_function(x, w, b))

    assert out.shape == (B, N - 1), out.shape
    assert bool(jnp.all(jnp.isfinite(out)))

    ref = _reference(x, w, b)
    assert bool(jnp.allclose(out, ref, rtol=2e-2, atol=2e-2)), (
        float(jnp.max(jnp.abs(out - ref))))

    print("KERNEL_OK")
</pallas_src>

<mosaic_0001>
module attributes {stable_mosaic.version = 11 : i64} {
  func.func @_energy_kernel(%arg0: i32, %arg1: memref<64x16xf32, #tpu.memory_space<vmem>>, %arg2: memref<16x32xbf16, #tpu.memory_space<vmem>>, %arg3: memref<1x32xf32, #tpu.memory_space<vmem>>, %arg4: memref<8x128xf32, #tpu.memory_space<vmem>>) attributes {dimension_semantics = [#tpu.dimension_semantics<parallel>], iteration_bounds = array<i64: 2>, scalar_prefetch = 0 : i64, scratch_operands = 0 : i64, tpu.core_type = #tpu.core_type<tc>, window_params = [{transform_indices = @transform_0, window_bounds = array<i64: 64, 16>}, {pipeline_mode = #tpu.pipeline_mode<synchronous>, transform_indices = @transform_1, window_bounds = array<i64: 16, 32>}, {pipeline_mode = #tpu.pipeline_mode<synchronous>, transform_indices = @transform_2, window_bounds = array<i64: 1, 32>}, {transform_indices = @transform_3, window_bounds = array<i64: 8, 128>}]} {
    %c0 = arith.constant 0 : index
    %c0_0 = arith.constant 0 : index
    %0 = vector.load %arg1[%c0, %c0_0] : memref<64x16xf32, #tpu.memory_space<vmem>>, vector<64x16xf32>
    %1 = arith.truncf %0 : vector<64x16xf32> to vector<64x16xbf16>
    %c0_1 = arith.constant 0 : index
    %c0_2 = arith.constant 0 : index
    %2 = vector.load %arg2[%c0_1, %c0_2] : memref<16x32xbf16, #tpu.memory_space<vmem>>, vector<16x32xbf16>
    %cst = arith.constant dense<0.000000e+00> : vector<64x32xf32>
    %3 = tpu.matmul %1, %2, %cst {dimension_numbers = #tpu.dot_dimension_numbers<[1], [0], [0], [1], [0, 0, 1, 1], [], []>} : vector<64x16xbf16>, vector<16x32xbf16>, vector<64x32xf32> -> vector<64x32xf32>
    %c0_3 = arith.constant 0 : index
    %c0_4 = arith.constant 0 : index
    %4 = vector.load %arg3[%c0_3, %c0_4] : memref<1x32xf32, #tpu.memory_space<vmem>>, vector<1x32xf32>
    %5 = vector.broadcast %4 : vector<1x32xf32> to vector<64x32xf32>
    %6 = arith.addf %3, %5 : vector<64x32xf32>
    %7 = arith.mulf %6, %6 : vector<64x32xf32>
    %cst_5 = arith.constant dense<0.000000e+00> : vector<64xf32>
    %8 = vector.multi_reduction <add>, %7, %cst_5 [1] : vector<64x32xf32> to vector<64xf32>
    %9 = vector.shape_cast %8 : vector<64xf32> to vector<64x1xf32>
    %cst_6 = arith.constant 0.999979972 : f32
    %10 = vector.broadcast %cst_6 : f32 to vector<64x1xf32>
    %11 = arith.cmpf ogt, %9, %10 : vector<64x1xf32>
    %cst_7 = arith.constant 1.000000e-30 : f32
    %12 = vector.broadcast %cst_7 : f32 to vector<64x1xf32>
    %13 = arith.addf %9, %12 : vector<64x1xf32>
    %14 = math.rsqrt %13 : vector<64x1xf32>
    %cst_8 = arith.constant 0.999989986 : f32
    %15 = vector.broadcast %cst_8 : f32 to vector<64x1xf32>
    %16 = arith.mulf %15, %14 : vector<64x1xf32>
    %cst_9 = arith.constant 1.000000e+00 : f32
    %17 = vector.broadcast %cst_9 : f32 to vector<64x1xf32>
    %18 = arith.select %11, %16, %17 : vector<64x1xi1>, vector<64x1xf32>
    %19 = vector.broadcast %18 : vector<64x1xf32> to vector<64x32xf32>
    %20 = arith.mulf %6, %19 : vector<64x32xf32>
    %cst_10 = arith.constant 0.999979972 : f32
    %21 = vector.broadcast %cst_10 : f32 to vector<64x1xf32>
    %22 = arith.minimumf %9, %21 : vector<64x1xf32>
    %23 = vector.shape_cast %20 : vector<64x32xf32> to vector<8x8x32xf32>
    %24 = vector.extract_strided_slice %23 {offsets = [0, 0, 0], sizes = [8, 1, 32], strides = [1, 1, 1]} : vector<8x8x32xf32> to vector<8x1x32xf32>
    %25 = vector.broadcast %24 : vector<8x1x32xf32> to vector<8x8x32xf32>
    %26 = arith.mulf %23, %25 : vector<8x8x32xf32>
    %cst_11 = arith.constant dense<0.000000e+00> : vector<8x8xf32>
    %27 = vector.multi_reduction <add>, %26, %cst_11 [2] : vector<8x8x32xf32> to vector<8x8xf32>
    %28 = vector.shape_cast %22 : vector<64x1xf32> to vector<8x8xf32>
    %29 = vector.extract_strided_slice %28 {offsets = [0, 0], sizes = [8, 1], strides = [1, 1]} : vector<8x8xf32> to vector<8x1xf32>
    %30 = vector.broadcast %29 : vector<8x1xf32> to vector<8x8xf32>
    %31 = arith.addf %30, %28 : vector<8x8xf32>
    %cst_12 = arith.constant 2.000000e+00 : f32
    %32 = vector.broadcast %cst_12 : f32 to vector<8x8xf32>
    %33 = arith.mulf %32, %27 : vector<8x8xf32>
    %34 = arith.subf %31, %33 : vector<8x8xf32>
    %cst_13 = arith.constant 0.000000e+00 : f32
    %35 = vector.broadcast %cst_13 : f32 to vector<8x8xf32>
    %36 = arith.maximumf %34, %35 : vector<8x8xf32>
    %cst_14 = arith.constant 1.000000e+00 : f32
    %37 = vector.broadcast %cst_14 : f32 to vector<8x1xf32>
    %38 = arith.subf %37, %29 : vector<8x1xf32>
    %cst_15 = arith.constant 9.99999974E-6 : f32
    %39 = vector.broadcast %cst_15 : f32 to vector<8x1xf32>
    %40 = arith.maximumf %38, %39 : vector<8x1xf32>
    %cst_16 = arith.constant 1.000000e+00 : f32
    %41 = vector.broadcast %cst_16 : f32 to vector<8x8xf32>
    %42 = arith.subf %41, %28 : vector<8x8xf32>
    %cst_17 = arith.constant 9.99999974E-6 : f32
    %43 = vector.broadcast %cst_17 : f32 to vector<8x8xf32>
    %44 = arith.maximumf %42, %43 : vector<8x8xf32>
    %cst_18 = arith.constant 2.000000e+00 : f32
    %45 = vector.broadcast %cst_18 : f32 to vector<8x8xf32>
    %46 = arith.mulf %45, %36 : vector<8x8xf32>
    %47 = vector.broadcast %40 : vector<8x1xf32> to vector<8x8xf32>
    %48 = arith.mulf %47, %44 : vector<8x8xf32>
    %49 = arith.divf %46, %48 : vector<8x8xf32>
    %cst_19 = arith.constant 2.000000e+00 : f32
    %50 = vector.broadcast %cst_19 : f32 to vector<8x8xf32>
    %51 = arith.addf %49, %50 : vector<8x8xf32>
    %52 = arith.mulf %49, %51 : vector<8x8xf32>
    %53 = math.sqrt %52 : vector<8x8xf32>
    %54 = arith.addf %49, %53 : vector<8x8xf32>
    %55 = math.log1p %54 : vector<8x8xf32>
    %cst_20 = arith.constant 0.000000e+00 : f32
    %56 = vector.broadcast %cst_20 : f32 to vector<8x120xf32>
    %57 = tpu.concatenate %55, %56 in 1 : vector<8x8xf32>, vector<8x120xf32> -> vector<8x128xf32>
    %c0_21 = arith.constant 0 : index
    %c0_22 = arith.constant 0 : index
    %58 = vector.load %arg4[%c0_21, %c0_22] : memref<8x128xf32, #tpu.memory_space<vmem>>, vector<8x128xf32>
    tpu.vector_store %arg4[%c0_21, %c0_22], %57 {strides = array<i32>} : memref<8x128xf32, #tpu.memory_space<vmem>>, vector<8x128xf32>,
    return
  }
  func.func @transform_0(%arg0: i32) -> (i32, i32) {
    %c0_i32 = arith.constant 0 : i32
    %c0_i32_0 = arith.constant 0 : i32
    return %arg0, %c0_i32 : i32, i32
  }
  func.func @transform_1(%arg0: i32) -> (i32, i32) {
    %c0_i32 = arith.constant 0 : i32
    %c0_i32_0 = arith.constant 0 : i32
    %c0_i32_1 = arith.constant 0 : i32
    return %c0_i32, %c0_i32_0 : i32, i32
  }
  func.func @transform_2(%arg0: i32) -> (i32, i32) {
    %c0_i32 = arith.constant 0 : i32
    %c0_i32_0 = arith.constant 0 : i32
    %c0_i32_1 = arith.constant 0 : i32
    return %c0_i32, %c0_i32_0 : i32, i32
  }
  func.func @transform_3(%arg0: i32) -> (i32, i32) {
    %c0_i32 = arith.constant 0 : i32
    %c0_i32_0 = arith.constant 0 : i32
    return %arg0, %c0_i32 : i32, i32
  }
}

module attributes {stable_mosaic.version = 11 : i64} {
  func.func @_energy_kernel(%arg0: i32, %arg1: memref<64x16xf32, #tpu.memory_space<vmem>>, %arg2: memref<16x32xbf16, #tpu.memory_space<vmem>>, %arg3: memref<1x32xf32, #tpu.memory_space<vmem>>, %arg4: memref<8x128xf32, #tpu.memory_space<vmem>>) attributes {dimension_semantics = [#tpu.dimension_semantics<parallel>], iteration_bounds = array<i64: 2>, scalar_prefetch = 0 : i64, scratch_operands = 0 : i64, tpu.core_type = #tpu.core_type<tc>, window_params = [{transform_indices = @transform_0, window_bounds = array<i64: 64, 16>}, {pipeline_mode = #tpu.pipeline_mode<synchronous>, transform_indices = @transform_1, window_bounds = array<i64: 16, 32>}, {pipeline_mode = #tpu.pipeline_mode<synchronous>, transform_indices = @transform_2, window_bounds = array<i64: 1, 32>}, {transform_indices = @transform_3, window_bounds = array<i64: 8, 128>}]} {
    %c0 = arith.constant 0 : index
    %c0_0 = arith.constant 0 : index
    %0 = vector.load %arg1[%c0, %c0_0] : memref<64x16xf32, #tpu.memory_space<vmem>>, vector<64x16xf32>
    %1 = arith.truncf %0 : vector<64x16xf32> to vector<64x16xbf16>
    %c0_1 = arith.constant 0 : index
    %c0_2 = arith.constant 0 : index
    %2 = vector.load %arg2[%c0_1, %c0_2] : memref<16x32xbf16, #tpu.memory_space<vmem>>, vector<16x32xbf16>
    %cst = arith.constant dense<0.000000e+00> : vector<64x32xf32>
    %3 = tpu.matmul %1, %2, %cst {dimension_numbers = #tpu.dot_dimension_numbers<[1], [0], [0], [1], [0, 0, 1, 1], [], []>} : vector<64x16xbf16>, vector<16x32xbf16>, vector<64x32xf32> -> vector<64x32xf32>
    %c0_3 = arith.constant 0 : index
    %c0_4 = arith.constant 0 : index
    %4 = vector.load %arg3[%c0_3, %c0_4] : memref<1x32xf32, #tpu.memory_space<vmem>>, vector<1x32xf32>
    %5 = vector.broadcast %4 : vector<1x32xf32> to vector<64x32xf32>
    %6 = arith.addf %3, %5 : vector<64x32xf32>
    %7 = arith.mulf %6, %6 : vector<64x32xf32>
    %cst_5 = arith.constant dense<0.000000e+00> : vector<64xf32>
    %8 = vector.multi_reduction <add>, %7, %cst_5 [1] : vector<64x32xf32> to vector<64xf32>
    %9 = vector.shape_cast %8 : vector<64xf32> to vector<64x1xf32>
    %cst_6 = arith.constant 0.999979972 : f32
    %10 = vector.broadcast %cst_6 : f32 to vector<64x1xf32>
    %11 = arith.cmpf ogt, %9, %10 : vector<64x1xf32>
    %cst_7 = arith.constant 1.000000e-30 : f32
    %12 = vector.broadcast %cst_7 : f32 to vector<64x1xf32>
    %13 = arith.addf %9, %12 : vector<64x1xf32>
    %14 = math.rsqrt %13 : vector<64x1xf32>
    %cst_8 = arith.constant 0.999989986 : f32
    %15 = vector.broadcast %cst_8 : f32 to vector<64x1xf32>
    %16 = arith.mulf %15, %14 : vector<64x1xf32>
    %cst_9 = arith.constant 1.000000e+00 : f32
    %17 = vector.broadcast %cst_9 : f32 to vector<64x1xf32>
    %18 = arith.select %11, %16, %17 : vector<64x1xi1>, vector<64x1xf32>
    %19 = vector.broadcast %18 : vector<64x1xf32> to vector<64x32xf32>
    %20 = arith.mulf %6, %19 : vector<64x32xf32>
    %cst_10 = arith.constant 0.999979972 : f32
    %21 = vector.broadcast %cst_10 : f32 to vector<64x1xf32>
    %22 = arith.minimumf %9, %21 : vector<64x1xf32>
    %23 = vector.shape_cast %20 : vector<64x32xf32> to vector<8x8x32xf32>
    %24 = vector.extract_strided_slice %23 {offsets = [0, 0, 0], sizes = [8, 1, 32], strides = [1, 1, 1]} : vector<8x8x32xf32> to vector<8x1x32xf32>
    %25 = vector.broadcast %24 : vector<8x1x32xf32> to vector<8x8x32xf32>
    %26 = arith.mulf %23, %25 : vector<8x8x32xf32>
    %cst_11 = arith.constant dense<0.000000e+00> : vector<8x8xf32>
    %27 = vector.multi_reduction <add>, %26, %cst_11 [2] : vector<8x8x32xf32> to vector<8x8xf32>
    %28 = vector.shape_cast %22 : vector<64x1xf32> to vector<8x8xf32>
    %29 = vector.extract_strided_slice %28 {offsets = [0, 0], sizes = [8, 1], strides = [1, 1]} : vector<8x8xf32> to vector<8x1xf32>
    %30 = vector.broadcast %29 : vector<8x1xf32> to vector<8x8xf32>
    %31 = arith.addf %30, %28 : vector<8x8xf32>
    %cst_12 = arith.constant 2.000000e+00 : f32
    %32 = vector.broadcast %cst_12 : f32 to vector<8x8xf32>
    %33 = arith.mulf %32, %27 : vector<8x8xf32>
    %34 = arith.subf %31, %33 : vector<8x8xf32>
    %cst_13 = arith.constant 0.000000e+00 : f32
    %35 = vector.broadcast %cst_13 : f32 to vector<8x8xf32>
    %36 = arith.maximumf %34, %35 : vector<8x8xf32>
    %cst_14 = arith.constant 1.000000e+00 : f32
    %37 = vector.broadcast %cst_14 : f32 to vector<8x1xf32>
    %38 = arith.subf %37, %29 : vector<8x1xf32>
    %cst_15 = arith.constant 9.99999974E-6 : f32
    %39 = vector.broadcast %cst_15 : f32 to vector<8x1xf32>
    %40 = arith.maximumf %38, %39 : vector<8x1xf32>
    %cst_16 = arith.constant 1.000000e+00 : f32
    %41 = vector.broadcast %cst_16 : f32 to vector<8x8xf32>
    %42 = arith.subf %41, %28 : vector<8x8xf32>
    %cst_17 = arith.constant 9.99999974E-6 : f32
    %43 = vector.broadcast %cst_17 : f32 to vector<8x8xf32>
    %44 = arith.maximumf %42, %43 : vector<8x8xf32>
    %cst_18 = arith.constant 2.000000e+00 : f32
    %45 = vector.broadcast %cst_18 : f32 to vector<8x8xf32>
    %46 = arith.mulf %45, %36 : vector<8x8xf32>
    %47 = vector.broadcast %40 : vector<8x1xf32> to vector<8x8xf32>
    %48 = arith.mulf %47, %44 : vector<8x8xf32>
    %49 = arith.divf %46, %48 : vector<8x8xf32>
    %cst_19 = arith.constant 2.000000e+00 : f32
    %50 = vector.broadcast %cst_19 : f32 to vector<8x8xf32>
    %51 = arith.addf %49, %50 : vector<8x8xf32>
    %52 = arith.mulf %49, %51 : vector<8x8xf32>
    %53 = math.sqrt %52 : vector<8x8xf32>
    %54 = arith.addf %49, %53 : vector<8x8xf32>
    %55 = math.log1p %54 : vector<8x8xf32>
    %cst_20 = arith.constant 0.000000e+00 : f32
    %56 = vector.broadcast %cst_20 : f32 to vector<8x120xf32>
    %57 = tpu.concatenate %55, %56 in 1 : vector<8x8xf32>, vector<8x120xf32> -> vector<8x128xf32>
    %c0_21 = arith.constant 0 : index
    %c0_22 = arith.constant 0 : index
    %58 = vector.load %arg4[%c0_21, %c0_22] : memref<8x128xf32, #tpu.memory_space<vmem>>, vector<8x128xf32>
    tpu.vector_store %arg4[%c0_21, %c0_22], %57 {strides = array<i32>} : memref<8x128xf32, #tpu.memory_space<vmem>>, vector<8x128xf32>,
    return
  }
  func.func @transform_0(%arg0: i32) -> (i32, i32) {
    %c0_i32 = arith.constant 0 : i32
    %c0_i32_0 = arith.constant 0 : i32
    return %arg0, %c0_i32 : i32, i32
  }
  func.func @transform_1(%arg0: i32) -> (i32, i32) {
    %c0_i32 = arith.constant 0 : i32
    %c0_i32_0 = arith.constant 0 : i32
    %c0_i32_1 = arith.constant 0 : i32
    return %c0_i32, %c0_i32_0 : i32, i32
  }
  func.func @transform_2(%arg0: i32) -> (i32, i32) {
    %c0_i32 = arith.constant 0 : i32
    %c0_i32_0 = arith.constant 0 : i32
    %c0_i32_1 = arith.constant 0 : i32
    return %c0_i32, %c0_i32_0 : i32, i32
  }
  func.func @transform_3(%arg0: i32) -> (i32, i32) {
    %c0_i32 = arith.constant 0 : i32
    %c0_i32_0 = arith.constant 0 : i32
    return %arg0, %c0_i32 : i32, i32
  }
}

</mosaic_0001>

<bundles_post_ra>
// kernel: tpu_custom_call.1
= control target key start
LH: loop header
LB: loop body
LE: loop exit
PB: predicated region body
PF: predicated region fallthrough
CT: control target
= control target key end

     0   :  { %8 = vsyncpa [#allocation3], 0  ;;  %s1832_s0 = inlined_call_operand.vmem [shape: f32[128,16], index: 0, kind: input, shape index: {}]   ;;  %s1833_s1 = inlined_call_operand.vmem [shape: bf16[16,32], index: 1, kind: input, shape index: {}]   ;;  %s1834_s2 = inlined_call_operand.vmem [shape: f32[1,32], index: 2, kind: input, shape index: {}]   ;;  %s1835_s3 = inlined_call_operand.hbm [shape: f32[16,128], index: 3, kind: output, shape index: {}]  }
   0x1   :  { %10 = vsyncpa [#allocation3 + $0x1], 0  ;;  %s1153_s12 = smov 0   ;;  %s1155_s13 = smov 0  }
   0x2   :  { %s1157_s14 = smov 0   ;;  %s1159_s15 = smov 0  }
   0x3 LB: > { %s941_s16 = sadd.s32 4294967295, %s1131_s15   ;;  %s942_s17 = sadd.s32 4294967294, %s1131_s15   ;;  %s1131_s15 = sphi %s1159_s15, %s1881_s15   ;;  %s1127_s14 = sphi %s1157_s14, %s1880_s14   ;;  %s1123_s13 = sphi %s1155_s13, %s1879_s13   ;;  %s1119_s12 = sphi %s1153_s12, %s1878_s12  }
   0x4   : > { %s1176_s18 = sadd.s32 1, %s1131_s15   ;;  %s91_s19 = sadd.s32 1, %s1127_s14 }
   0x5   : > { %s88_s20 = ssub.s32 %s1131_s15, %s1176_s18  ;;  %p101_p0 = scmp.ne.s32.totalorder %s1127_s14, %s1123_s13 }
   0x6   : > { %p89_p1 = scmp.eq.s32.totalorder %s88_s20, 0  ;;  %p102_p2 = scmp.eq.s32.totalorder %s941_s16, 1 }
   0x7   : > { %p107_p3 = scmp.ne.s32.totalorder %s1123_s13, %s1119_s12  ;;  %p108_p4 = scmp.eq.s32.totalorder %s942_s17, 1 }
   0x8   : > { %s1186_s21 = scalar_select %p89_p1, %s1127_s14, %s91_s19  }
   0x9   : > { %p1188_p5 = por %p102_p2, %p101_p0  ;;  %p1192_p6 = por %p108_p4, %p107_p3 }
   0xa   : > { %p945_p7 = scmp.ge.s32.totalorder %s1131_s15, 1  ;;  %p141_p8 = scmp.lt.s32.totalorder %s1131_s15, 3 }
   0xc   : > { %p142_p9 = pnand %p945_p7, %p141_p8 }
   0xd   : > { %s1201_s26 = sshll.u32 (!%p142_p9), %s941_s16, 3  ;;  %s162_s7 = sand.u32 (!%p142_p9), 1, %s1123_s13  }
   0xe   : > { %145 = sbr.rel (%p142_p9) target bundleno = 513 (0x201), region = 32  ;;  %p166_p10 = scmp.lt.s32.totalorder (!%p142_p9), %s1201_s26, 15 }
   0xf   : > { %s1792_s8 = sshll.u32 (!%p142_p9), %s162_s7, 3  ;;  %s878_s11 = scalar_lea.hbm (!%p142_p9), %s1835_s3, %s1201_s26 }
  0x10   : > { %s164_s16 = scalar_lea.vmem (!%p142_p9), [#allocation2], %s1792_s8  ;;  %s882_s19 = sshll.u32 (!%p142_p9), %s878_s11, 4  ;;  %s883_s19 = int_to_ptr.hbm [resolvable:$true] %s882_s19 }
  0x11   : > { %s880_s17 = sshll.u32 (!%p142_p9), %s164_s16, 4  ;;  %s868_s20 = scalar_lea.sflag (!%p142_p9), [#allocation3], %s162_s7  ;;  %s881_s17 = int_to_ptr.vmem [resolvable:$true] %s880_s17 }
  0x12   : > { %s1083_s24 = sshra.s32 (!%p142_p9), %s883_s19, 4  ;;  %s1084_s24 = int_to_ptr.hbm [resolvable:$true] %s1083_s24 }
  0x13   : > { %v961_v0 = vld [vmem:[%s1833_s1] sm:$0xff]  ;;  %s167_s27 = scalar_select %p166_p10, %s1201_s26, 15  ;;  %vm196_vm0 = vcmask 130048   ;;  %vm246_vm1 = vcmask 261120  }
  0x14   : > { %216 = vmatpush.bf16.msra.mxu0 %v961_v0  ;;  %962 = vmatpush.bf16.msra.mxu1 %v961_v0  ;;  %v1004_v13 = vld [vmem:[%s1834_s2] ss:$0 sm:$0xff]  ;;  %s1085_s25 = scalar_lea.hbm %s1084_s24, 8  ;;  %p1090_p0 = scmp.lt.s32.totalorder %s1084_s24, %s1835_s3 }
  0x15   : > { %963 = vmatpush.bf16.msra.mxu2 %v961_v0  ;;  %964 = vmatpush.bf16.msra.mxu3 %v961_v0  ;;  %s948_s28 = sshll.u32 %s167_s27, 3  ;;  %p1086_p11 = scmp.ne.s32.totalorder %s1084_s24, %s1085_s25 }
  0x16   : > { %s169_s4 = scalar_lea.vmem %s1832_s0, %s948_s28  ;;  %s1089_s28 = scalar_lea.hbm %s1835_s3, 16 }
  0x17   : > { %v172_v1 = vld [vmem:[%s169_s4] sm:$0xff]  ;;  %v173_v2 = vld [vmem:[%s169_s4 + $0x8] sm:$0xff]  ;;  %v174_v3 = vld [vmem:[%s169_s4 + $0x10] sm:$0xff]  ;;  %p1087_p12 = pnand %p1086_p11, %p1188_p5  ;;  %p1091_p1 = scmp.lt.s32.totalorder %s1089_s28, %s1085_s25 }
  0x18   : > { %v180_v4 = vpack.c.bf16 %v173_v2, %v172_v1  ;;  %v175_v5 = vld [vmem:[%s169_s4 + $0x18] sm:$0xff]  ;;  %v176_v6 = vld [vmem:[%s169_s4 + $0x20] sm:$0xff]  ;;  %v177_v7 = vld [vmem:[%s169_s4 + $0x28] sm:$0xff] }
  0x19   : > { %v181_v8 = vpack.c.bf16 %v175_v5, %v174_v3  ;;  %v182_v9 = vpack.c.bf16 %v177_v7, %v176_v6  ;;  %v178_v10 = vld [vmem:[%s169_s4 + $0x30] sm:$0xff]  ;;  %v179_v11 = vld [vmem:[%s169_s4 + $0x38] sm:$0xff]  ;;  %p1088_p13 = pneg %p1087_p12  ;;  %p1092_p2 = por %p1091_p1, %p1090_p0 }
  0x1a   : > { %953 = vmatmul.msk.bf16.vlgmr.msra.gmra.mxu0 %vm196_vm0, %v180_v4  ;;  %v183_v12 = vpack.c.bf16 %v179_v11, %v178_v10 }
  0x1b   : > { %954 = vmatmul.msk.bf16.vlgmr.msra.gmra.mxu1 %vm196_vm0, %v181_v8  ;;  %955 = vmatmul.msk.bf16.vlgmr.msra.gmra.mxu2 %vm196_vm0, %v182_v9  ;;  %p1093_p3 = pnand %p1092_p2, %p1088_p13 }
  0x1c   : > { %956 = vmatmul.msk.bf16.vlgmr.msra.gmra.mxu3 %vm196_vm0, %v183_v12 }
  0x97   : > { %v218_v14 = vpop.f32.mrf.mxu0 }
  0x98   : > { %v1211_v15 = vadd.f32 %v1004_v13, %v218_v14  ;;  %v223_v16 = vpop.f32.mrf.mxu1 }
  0x99   : > { %v1213_v17 = vadd.f32 %v1004_v13, %v223_v16 }
  0x9a   : > { %v238_v18 = vmul.f32 %v1211_v15, %v1211_v15 }
  0x9b   : > { %v240_v19 = vmul.f32 %v1213_v17, %v1213_v17 }
  0x9c   : > { %v247_v20 = vsel %vm246_vm1, %v238_v18, 0.0 }
  0x9d   : > { %v253_v21 = vsel %vm246_vm1, %v240_v19, 0.0  ;;  %248 = vadd.xlane.f32.xlu0 %v247_v20 }
  0x9e   : > { %v228_v22 = vpop.f32.mrf.mxu2  ;;  %254 = vadd.xlane.f32.xlu1 %v253_v21 }
  0x9f   : > { %v1221_v23 = vadd.f32 %v1004_v13, %v228_v22  ;;  %v233_v24 = vpop.f32.mrf.mxu3  ;;  %v220_v25 = vpop.f32.mrf.mxu0 }
  0xa0   : > { %v1223_v26 = vadd.f32 %v1004_v13, %v220_v25  ;;  %v225_v27 = vpop.f32.mrf.mxu1  ;;  %v1234_v33 = vadd.f32 %v1004_v13, %v233_v24 }
  0xa1   : > { %v1225_v28 = vadd.f32 %v1004_v13, %v225_v27  ;;  %v242_v29 = vmul.f32 %v1221_v23, %v1221_v23 }
  0xa2   : > { %v239_v30 = vmul.f32 %v1223_v26, %v1223_v26  ;;  %v244_v40 = vmul.f32 %v1234_v33, %v1234_v33 }
  0xa3   : > { %v259_v31 = vsel %vm246_vm1, %v242_v29, 0.0  ;;  %v241_v32 = vmul.f32 %v1225_v28, %v1225_v28 }
  0xa4   : > { %260 = vadd.xlane.f32.xlu2 %v259_v31  ;;  %v250_v34 = vsel %vm246_vm1, %v239_v30, 0.0  ;;  %v265_v44 = vsel %vm246_vm1, %v244_v40, 0.0 }
  0xa5   : > { %v256_v35 = vsel %vm246_vm1, %v241_v32, 0.0  ;;  %251 = vadd.xlane.f32.xlu0 %v250_v34 }
  0xa6   : > { %v230_v36 = vpop.f32.mrf.mxu2  ;;  %257 = vadd.xlane.f32.xlu1 %v256_v35 }
  0xa7   : > { %v1238_v37 = vadd.f32 %v1004_v13, %v230_v36  ;;  %v235_v38 = vpop.f32.mrf.mxu3 }
  0xa8   : > { %v1240_v39 = vadd.f32 %v1004_v13, %v235_v38 }
  0xa9   : > { %v243_v41 = vmul.f32 %v1238_v37, %v1238_v37 }
  0xaa   : > { %v245_v42 = vmul.f32 %v1240_v39, %v1240_v39 }
  0xab   : > { %v262_v43 = vsel %vm246_vm1, %v243_v41, 0.0 }
  0xac   : > { %263 = vadd.xlane.f32.xlu2 %v262_v43  ;;  %v268_v45 = vsel %vm246_vm1, %v245_v42, 0.0 }
  0xad   : > { %266 = vadd.xlane.f32.xlu0 %v265_v44 }
  0xae   : > { %269 = vadd.xlane.f32.xlu1 %v268_v45 }
 0x110   : > { %v1251_v46 = vpop.xlane.xlu0 %248 }
 0x111   : > { %v1253_v47 = vpop.xlane.xlu1 %254  ;;  %v279_v48 = vadd.f32 1e-30, %v1251_v46  ;;  %vm271_vm14 = vcmp.gt.f32.partialorder %v1251_v46, 0.99998 }
 0x112   : > { %v281_v49 = vadd.f32 1e-30, %v1253_v47  ;;  %vm273_vm13 = vcmp.gt.f32.partialorder %v1253_v47, 0.99998 }
 0x113   : > { %1005 = vrsqrt.f32 %v279_v48  ;;  %vm293_vm4 = vweird.f32 %v279_v48 }
 0x114   : > { %1007 = vrsqrt.f32 %v281_v49  ;;  %vm313_vm5 = vweird.f32 %v281_v49 }
 0x117   : > { %v1257_v50 = vpop.xlane.xlu2 %260 }
 0x118   : > { %v283_v51 = vadd.f32 1e-30, %v1257_v50  ;;  %v1260_v52 = vpop.xlane.xlu0 %251 }
 0x119   : > { %v1006_v53 = vpop.eup %1005  ;;  %v1263_v54 = vadd.f32 1e-30, %v1260_v52  ;;  %v1265_v57 = vpop.xlane.xlu1 %257 }
 0x11a   : > { %v1008_v55 = vpop.eup %1007  ;;  %v288_v56 = vmul.f32 %v1006_v53, %v279_v48  ;;  %1009 = vrsqrt.f32 %v283_v51  ;;  %v282_v61 = vadd.f32 1e-30, %v1265_v57  ;;  %vm294_vm2 = vweird.f32 %v1006_v53 }
 0x11b   : > { %v308_v58 = vmul.f32 %v1008_v55, %v281_v49  ;;  %1011 = vrsqrt.f32 %v1263_v54  ;;  %vm314_vm3 = vweird.f32 %v1008_v55  ;;  %vm1278_vm6 = vmor %vm293_vm4, %vm294_vm2  ;;  %vm333_vm9 = vweird.f32 %v283_v51 }
 0x11c   : > { %v289_v59 = vmul.f32 %v1006_v53, %v288_v56  ;;  %1013 = vrsqrt.f32 %v282_v61  ;;  %vm315_vm7 = vmor %vm313_vm5, %vm314_vm3  ;;  %vm303_vm15 = vweird.f32 %v1263_v54  ;;  %vm323_vm0 = vweird.f32 %v282_v61 }
 0x11d   : > { %v309_v60 = vmul.f32 %v1008_v55, %v308_v58  ;;  %vm275_vm4 = vcmp.gt.f32.partialorder %v1257_v50, 0.99998  ;;  %vm274_vm5 = vcmp.gt.f32.partialorder %v1265_v57, 0.99998 }
 0x11e   : > { %v290_v62 = vmul.f32 0.5, %v289_v59 }
 0x11f   : > { %v310_v63 = vmul.f32 0.5, %v309_v60  ;;  %v1269_v4 = vpop.xlane.xlu2 %263 }
 0x120   : > { %v1010_v0 = vpop.eup %1009  ;;  %v291_v1 = vsub.f32 1.5, %v290_v62  ;;  %v1276_v10 = vadd.f32 1e-30, %v1269_v4  ;;  %v1298_v36 = vpop.xlane.xlu0 %266 }
 0x121   : > { %v311_v2 = vsub.f32 1.5, %v310_v63  ;;  %v328_v3 = vmul.f32 %v1010_v0, %v283_v51  ;;  %v1271_v5 = vpop.eup %1011  ;;  %vm334_vm8 = vweird.f32 %v1010_v0  ;;  %v1285_v20 = vpop.xlane.xlu1 %269  ;;  %v1310_v45 = vadd.f32 1e-30, %v1298_v36 }
 0x122   : > { %v292_v6 = vmul.f32 %v1006_v53, %v291_v1  ;;  %v298_v9 = vmul.f32 %v1271_v5, %v1263_v54  ;;  %v1014_v11 = vpop.eup %1013  ;;  %1015 = vrsqrt.f32 %v1276_v10  ;;  %vm1288_vm10 = vmor %vm333_vm9, %vm334_vm8  ;;  %v1293_v31 = vadd.f32 1e-30, %v1285_v20 }
 0x123   : > { %v329_v7 = vmul.f32 %v1010_v0, %v328_v3  ;;  %v312_v8 = vmul.f32 %v1008_v55, %v311_v2  ;;  %v318_v14 = vmul.f32 %v1014_v11, %v282_v61  ;;  %vm304_vm11 = vweird.f32 %v1271_v5 }
 0x124   : > { %v299_v16 = vmul.f32 %v1271_v5, %v298_v9  ;;  %v296_v18 = vsel %vm1278_vm6, %v1006_v53, %v292_v6  ;;  %vm324_vm12 = vweird.f32 %v1014_v11  ;;  %1017 = vrsqrt.f32 %v1293_v31  ;;  %vm1305_vm2 = vmor %vm303_vm15, %vm304_vm11 }
 0x125   : > { %v330_v12 = vmul.f32 0.5, %v329_v7  ;;  %v316_v21 = vsel %vm315_vm7, %v1008_v55, %v312_v8  ;;  %v319_v22 = vmul.f32 %v1014_v11, %v318_v14  ;;  %v367_v34 = vmul.f32 0.99999, %v296_v18  ;;  %vm325_vm3 = vmor %vm323_vm0, %vm324_vm12 }
 0x126   : > { %v300_v24 = vmul.f32 0.5, %v299_v16  ;;  %v369_v32 = vmul.f32 0.99999, %v316_v21  ;;  %1019 = vrsqrt.f32 %v1310_v45  ;;  %vm272_vm7 = vcmp.gt.f32.partialorder %v1260_v52, 0.99998 }
 0x127   : > { %v331_v19 = vsub.f32 1.5, %v330_v12  ;;  %v320_v29 = vmul.f32 0.5, %v319_v22  ;;  %v375_v49 = vsel %vm271_vm14, %v367_v34, 1.0  ;;  %vm343_vm8 = vweird.f32 %v1276_v10 }
 0x128   : > { %v301_v30 = vsub.f32 1.5, %v300_v24  ;;  %v1016_v41 = vpop.eup %1015  ;;  %v377_v48 = vsel %vm273_vm13, %v369_v32, 1.0  ;;  %v383_v61 = vmul.f32 %v375_v49, %v1211_v15  ;;  %vm276_vm11 = vcmp.gt.f32.partialorder %v1269_v4, 0.99998 }
 0x129   : > { %v332_v25 = vmul.f32 %v1010_v0, %v331_v19  ;;  %v321_v38 = vsub.f32 1.5, %v320_v29  ;;  %v338_v51 = vmul.f32 %v1016_v41, %v1276_v10  ;;  %v385_v60 = vmul.f32 %v377_v48, %v1213_v17 }
 0x12a   : > { %v302_v40 = vmul.f32 %v1271_v5, %v301_v30  ;;  %v1018_v58 = vpop.eup %1017  ;;  %vm344_vm6 = vweird.f32 %v1016_v41  ;;  %v399_v3 = vperm.slane %v383_v61, 0  ;;  %vm363_vm12 = vweird.f32 %v1293_v31 }
 0x12b   : > { %v336_v35 = vsel %vm1288_vm10, %v1010_v0, %v332_v25  ;;  %v322_v43 = vmul.f32 %v1014_v11, %v321_v38  ;;  %v339_v56 = vmul.f32 %v1016_v41, %v338_v51  ;;  %v358_v1 = vmul.f32 %v1018_v58, %v1293_v31  ;;  %vm345_vm9 = vmor %vm343_vm8, %vm344_vm6 }
 0x12c   : > { %v371_v42 = vmul.f32 0.99999, %v336_v35  ;;  %v306_v54 = vsel %vm1305_vm2, %v1271_v5, %v302_v40  ;;  %v401_v2 = vperm.slane %v385_v60, 0  ;;  %v1020_v9 = vpop.eup %1019  ;;  %v407_v17 = vmul.f32 %v399_v3, %v383_v61 }
 0x12d   : > { %v326_v53 = vsel %vm325_vm3, %v1014_v11, %v322_v43  ;;  %v368_v63 = vmul.f32 0.99999, %v306_v54  ;;  %v340_v0 = vmul.f32 0.5, %v339_v56  ;;  %v359_v6 = vmul.f32 %v1018_v58, %v358_v1 }
 0x12e   : > { %v370_v55 = vmul.f32 0.99999, %v326_v53  ;;  %v379_v59 = vsel %vm275_vm4, %v371_v42, 1.0  ;;  %v409_v15 = vmul.f32 %v401_v2, %v385_v60  ;;  %v348_v14 = vmul.f32 %v1020_v9, %v1310_v45 }
 0x12f   : > { %v341_v5 = vsub.f32 1.5, %v340_v0  ;;  %v387_v7 = vmul.f32 %v379_v59, %v1221_v23  ;;  %v376_v11 = vsel %vm272_vm7, %v368_v63, 1.0  ;;  %v360_v13 = vmul.f32 0.5, %v359_v6 }
 0x130   : > { %v378_v62 = vsel %vm274_vm5, %v370_v55, 1.0  ;;  %vm364_vm10 = vweird.f32 %v1018_v58  ;;  %v421_v16 = vsel %vm246_vm1, %v409_v15, 0.0  ;;  %v415_v23 = vsel %vm246_vm1, %v407_v17, 0.0 }
 0x131   : > { %v386_v8 = vmul.f32 %v378_v62, %v1225_v28  ;;  %v342_v12 = vmul.f32 %v1016_v41, %v341_v5  ;;  %v403_v28 = vperm.slane %v387_v7, 0  ;;  %v361_v19 = vsub.f32 1.5, %v360_v13  ;;  %422 = vadd.xlane.f32.xlu1 %v421_v16  ;;  %416 = vadd.xlane.f32.xlu2 %v415_v23  ;;  %vm365_vm13 = vmor %vm363_vm12, %vm364_vm10 }
 0x132   : > { %v349_v21 = vmul.f32 %v1020_v9, %v348_v14  ;;  %v384_v25 = vmul.f32 %v376_v11, %v1223_v26  ;;  %vm354_vm14 = vweird.f32 %v1020_v9  ;;  %vm278_vm15 = vcmp.gt.f32.partialorder %v1285_v20, 0.99998 }
 0x133   : > { %v346_v18 = vsel %vm345_vm9, %v1016_v41, %v342_v12  ;;  %v402_v10 = vperm.slane %v386_v8, 0  ;;  %v411_v24 = vmul.f32 %v403_v28, %v387_v7  ;;  %v362_v27 = vmul.f32 %v1018_v58, %v361_v19 }
 0x134   : > { %v372_v22 = vmul.f32 0.99999, %v346_v18  ;;  %v350_v29 = vmul.f32 0.5, %v349_v21  ;;  %v400_v35 = vperm.slane %v384_v25, 0  ;;  %vm353_vm0 = vweird.f32 %v1310_v45 }
 0x135   : > { %v410_v30 = vmul.f32 %v402_v10, %v386_v8  ;;  %v427_v34 = vsel %vm246_vm1, %v411_v24, 0.0  ;;  %v366_v38 = vsel %vm365_vm13, %v1018_v58, %v362_v27  ;;  %vm355_vm2 = vmor %vm353_vm0, %vm354_vm14  ;;  %vm277_vm3 = vcmp.gt.f32.partialorder %v1298_v36, 0.99998 }
 0x136   : > { %v380_v32 = vsel %vm276_vm11, %v372_v22, 1.0  ;;  %v351_v40 = vsub.f32 1.5, %v350_v29  ;;  %428 = vadd.xlane.f32.xlu0 %v427_v34  ;;  %v374_v42 = vmul.f32 0.99999, %v366_v38  ;;  %v408_v48 = vmul.f32 %v400_v35, %v384_v25 }
 0x137   : > { %v388_v41 = vmul.f32 %v380_v32, %v1238_v37  ;;  %v424_v26 = vsel %vm246_vm1, %v410_v30, 0.0  ;;  %v393_v63 = vmin.f32 %v1253_v47, 0.99998  ;;  %v391_v0 = vmin.f32 %v1251_v46, 0.99998 }
 0x138   : > { %v352_v31 = vmul.f32 %v1020_v9, %v351_v40  ;;  %v382_v44 = vsel %vm278_vm15, %v374_v42, 1.0  ;;  %v418_v56 = vsel %vm246_vm1, %v408_v48, 0.0  ;;  %v1349_v6 = vmin.f32 %v1257_v50, 0.99998 }
 0x139   : > { %v404_v43 = vperm.slane %v388_v41, 0  ;;  %425 = vadd.xlane.f32.xlu2 %v424_v26  ;;  %v390_v53 = vmul.f32 %v382_v44, %v1240_v39  ;;  %v481_v1 = vsub.f32 1.0, %v393_v63  ;;  %v479_v2 = vsub.f32 1.0, %v391_v0 }
 0x13a   : > { %v356_v49 = vsel %vm355_vm2, %v1020_v9, %v352_v31  ;;  %v483_v8 = vsub.f32 1.0, %v1349_v6  ;;  %v1353_v9 = vmin.f32 %v1265_v57, 0.99998  ;;  %v1362_v11 = vmin.f32 %v1269_v4, 0.99998 }
 0x13b   : > { %v412_v51 = vmul.f32 %v404_v43, %v388_v41  ;;  %v373_v54 = vmul.f32 0.99999, %v356_v49  ;;  %v406_v58 = vperm.slane %v390_v53, 0  ;;  %v489_v3 = vmax.f32 %v481_v1, 1e-05 }
 0x13c   : > { %v487_v5 = vmax.f32 %v479_v2, 1e-05  ;;  %v491_v47 = vmax.f32 %v483_v8, 1e-05  ;;  %v482_v46 = vsub.f32 1.0, %v1353_v9  ;;  %v484_v13 = vsub.f32 1.0, %v1362_v11 }
 0x13d   : > { %v430_v37 = vsel %vm246_vm1, %v412_v51, 0.0  ;;  %v381_v55 = vsel %vm277_vm3, %v373_v54, 1.0  ;;  %v414_v60 = vmul.f32 %v406_v58, %v390_v53  ;;  %v1373_v28 = vmin.f32 %v1260_v52, 0.99998 }
 0x13e   : > { %431 = vadd.xlane.f32.xlu1 %v430_v37  ;;  %419 = vadd.xlane.f32.xlu0 %v418_v56  ;;  %v389_v45 = vmul.f32 %v381_v55, %v1234_v33  ;;  %v505_v33 = vperm.slane %v489_v3, 0  ;;  %v503_v7 = vperm.slane %v487_v5, 0  ;;  %v507_v50 = vperm.slane %v491_v47, 0 }
 0x13f   : > { %v436_v39 = vsel %vm246_vm1, %v414_v60, 0.0  ;;  %v490_v12 = vmax.f32 %v482_v46, 1e-05  ;;  %v492_v18 = vmax.f32 %v484_v13, 1e-05  ;;  %v480_v22 = vsub.f32 1.0, %v1373_v28 }
 0x140   : > { %v405_v59 = vperm.slane %v389_v45, 0  ;;  %v1355_v15 = vmul.f32 %v505_v33, %v489_v3  ;;  %v1357_v17 = vmul.f32 %v503_v7, %v487_v5  ;;  %v1370_v16 = vmul.f32 %v507_v50, %v491_v47 }
 0x141   : > { %v506_v23 = vperm.slane %v490_v12, 0  ;;  %v1376_v4 = vmin.f32 %v1298_v36, 0.99998  ;;  %v1387_v24 = vmin.f32 %v1285_v20, 0.99998  ;;  %v508_v52 = vperm.slane %v492_v18, 0 }
 0x142   : > { %v413_v61 = vmul.f32 %v405_v59, %v389_v45  ;;  %1021 = vrcp.f32 %v1355_v15  ;;  %v488_v29 = vmax.f32 %v480_v22, 1e-05  ;;  %v441_v32 = vperm.slane %v393_v63, 0 }
 0x143   : > { %1023 = vrcp.f32 %v1357_v17  ;;  %v1383_v10 = vmul.f32 %v506_v23, %v490_v12  ;;  %v485_v25 = vsub.f32 1.0, %v1376_v4  ;;  %v486_v30 = vsub.f32 1.0, %v1387_v24 }
 0x144   : > { %v433_v62 = vsel %vm246_vm1, %v413_v61, 0.0  ;;  %1025 = vrcp.f32 %v1370_v16  ;;  %v1392_v34 = vmul.f32 %v508_v52, %v492_v18  ;;  %v439_v20 = vperm.slane %v391_v0, 0 }
 0x145   : > { %434 = vadd.xlane.f32.xlu2 %v433_v62  ;;  %1027 = vrcp.f32 %v1383_v10  ;;  %v493_v35 = vmax.f32 %v485_v25, 1e-05  ;;  %v504_v42 = vperm.slane %v488_v29, 0  ;;  %v494_v26 = vmax.f32 %v486_v30, 1e-05 }
 0x146   : > { %437 = vadd.xlane.f32.xlu0 %v436_v39  ;;  %v449_v31 = vadd.f32 %v441_v32, %v393_v63  ;;  %1029 = vrcp.f32 %v1392_v34  ;;  %vm554_vm1 = vweird.f32 %v1355_v15  ;;  %v558_v51 = vand.u32 2147483647, %v1355_v15 }
 0x147   : > { %v509_v43 = vperm.slane %v493_v35, 0  ;;  %v447_v54 = vadd.f32 %v439_v20, %v391_v0  ;;  %v560_v45 = vand.u32 2147483648, %v1355_v15  ;;  %vm524_vm6 = vweird.f32 %v1357_v17 }
 0x148   : > { %v1366_v57 = vpop.eup %1021  ;;  %v528_v59 = vand.u32 2147483647, %v1357_v17  ;;  %v530_v60 = vand.u32 2147483648, %v1357_v17  ;;  %v1421_v1 = vmul.f32 %v504_v42, %v488_v29  ;;  %v510_v2 = vperm.slane %v494_v26, 0 }
 0x149   : > { %v1368_v14 = vpop.eup %1023  ;;  %v550_v19 = vmul.f32 %v1366_v57, %v1355_v15  ;;  %vm555_vm4 = vweird.f32 %v1366_v57  ;;  %v1423_v3 = vmul.f32 %v509_v43, %v493_v35  ;;  %vm1425_vm8 = vcmp.eq.f32.partialorder %v558_v51, 8.507059e+37 }
 0x14a   : > { %v520_v21 = vmul.f32 %v1368_v14, %v1357_v17  ;;  %v1394_v38 = vpop.eup %1025  ;;  %vm525_vm5 = vweird.f32 %v1368_v14  ;;  %vm1415_vm7 = vmor %vm554_vm1, %vm555_vm4  ;;  %v561_v46 = vor.u32 1.1754944e-38, %v560_v45  ;;  %vm529_vm10 = vcmp.eq.f32.partialorder %v528_v59, 8.507059e+37 }
 0x14b   : > { %v551_v36 = vsub.f32 1.0, %v550_v19  ;;  %v580_v44 = vmul.f32 %v1394_v38, %v1370_v16  ;;  %v1402_v48 = vpop.eup %1027  ;;  %vm1431_vm9 = vmor %vm524_vm6, %vm525_vm5  ;;  %v531_v50 = vor.u32 1.1754944e-38, %v530_v60  ;;  %v443_v12 = vperm.slane %v1349_v6, 0 }
 0x14c   : > { %v521_v27 = vsub.f32 1.0, %v520_v21  ;;  %v565_v0 = vmul.f32 %v1402_v48, %v1383_v10  ;;  %v1435_v7 = vpop.eup %1029  ;;  %1031 = vrcp.f32 %v1421_v1  ;;  %v1450_v22 = vmul.f32 %v510_v2, %v494_v26 }
 0x14d   : > { %v552_v40 = vmul.f32 %v1366_v57, %v551_v36  ;;  %v581_v63 = vsub.f32 1.0, %v580_v44  ;;  %1033 = vrcp.f32 %v1423_v3  ;;  %v451_v29 = vadd.f32 %v443_v12, %v1349_v6 }
 0x14e   : > { %v522_v41 = vmul.f32 %v1368_v14, %v521_v27  ;;  %v566_v19 = vsub.f32 1.0, %v565_v0  ;;  %v442_v27 = vperm.slane %v1353_v9, 0  ;;  %vm585_vm11 = vweird.f32 %v1394_v38 }
 0x14f   : > { %v553_v49 = vadd.f32 %v1366_v57, %v552_v40  ;;  %v582_v18 = vmul.f32 %v1394_v38, %v581_v63  ;;  %vm584_vm12 = vweird.f32 %v1370_v16  ;;  %v588_v43 = vand.u32 2147483647, %v1370_v16 }
 0x150   : > { %v523_v56 = vadd.f32 %v1368_v14, %v522_v41  ;;  %v567_v20 = vmul.f32 %v1402_v48, %v566_v19  ;;  %v590_v41 = vand.u32 2147483648, %v1370_v16  ;;  %v450_v44 = vadd.f32 %v442_v27, %v1353_v9  ;;  %vm1478_vm13 = vmor %vm584_vm12, %vm585_vm11 }
 0x151   : > { %v557_v8 = vsel %vm1415_vm7, %v1366_v57, %v553_v49  ;;  %v583_v40 = vadd.f32 %v1394_v38, %v582_v18  ;;  %vm570_vm14 = vweird.f32 %v1402_v48  ;;  %v444_v59 = vperm.slane %v1362_v11, 0 }
 0x152   : > { %v527_v17 = vsel %vm1431_vm9, %v1368_v14, %v523_v56  ;;  %v562_v57 = vsel %vm1425_vm8, %v561_v46, %v557_v8  ;;  %v595_v14 = vmul.f32 %v1435_v7, %v1392_v34  ;;  %v1474_v51 = vpop.eup %1031  ;;  %v568_v16 = vadd.f32 %v1402_v48, %v567_v20 }
 0x153   : > { %v532_v21 = vsel %vm529_vm10, %v531_v50, %v527_v17  ;;  %v587_v9 = vsel %vm1478_vm13, %v1394_v38, %v583_v40  ;;  %v575_v56 = vand.u32 2147483648, %v1383_v10  ;;  %v591_v45 = vor.u32 1.1754944e-38, %v590_v41 }
 0x154   : > { %v596_v26 = vsub.f32 1.0, %v595_v14  ;;  %vm589_vm15 = vcmp.eq.f32.partialorder %v588_v43, 8.507059e+37  ;;  %vm569_vm0 = vweird.f32 %v1383_v10  ;;  %vm599_vm1 = vweird.f32 %v1392_v34 }
 0x155   : > { %vm1498_vm2 = vmor %vm569_vm0, %vm570_vm14  ;;  %v535_v0 = vmul.f32 %v1474_v51, %v1421_v1  ;;  %v576_v5 = vor.u32 1.1754944e-38, %v575_v56  ;;  %vm600_vm4 = vweird.f32 %v1435_v7  ;;  %vm539_vm7 = vweird.f32 %v1421_v1 }
 0x156   : > { %v597_v60 = vmul.f32 %v1435_v7, %v596_v26  ;;  %vm1539_vm5 = vmor %vm599_vm1, %vm600_vm4  ;;  %vm540_vm8 = vweird.f32 %v1474_v51  ;;  %v446_v27 = vperm.slane %v1387_v24, 0  ;;  %vm614_vm12 = vweird.f32 %v1423_v3 }
 0x157   : > { %vm1583_vm11 = vmor %vm539_vm7, %vm540_vm8  ;;  %vm629_vm1 = vweird.f32 %v1450_v22 }
 0x158   : > { %v598_v17 = vadd.f32 %v1435_v7, %v597_v60 }
 0x1a4   : > { %v423_v53 = vpop.xlane.xlu1 %422  ;;  %v417_v37 = vpop.xlane.xlu2 %416 }
 0x1a5   : > { %v457_v55 = vmul.f32 2.0, %v423_v53  ;;  %v455_v58 = vmul.f32 2.0, %v417_v37  ;;  %v573_v37 = vand.u32 2147483647, %v1383_v10  ;;  %v572_v10 = vsel %vm1498_vm2, %v1402_v48, %v568_v16 }
 0x1a7   : > { %v465_v62 = vsub.f32 %v449_v31, %v457_v55  ;;  %v463_v39 = vsub.f32 %v447_v54, %v455_v58  ;;  %v1490_v58 = vpop.eup %1033  ;;  %vm1502_vm3 = vcmp.eq.f32.partialorder %v573_v37, 8.507059e+37  ;;  %v543_v37 = vand.u32 2147483647, %v1421_v1 }
 0x1a8   : > { %vm615_vm10 = vweird.f32 %v1490_v58 }
 0x1a9   : > { %v473_v15 = vmax.f32 %v465_v62, 0.0  ;;  %v471_v47 = vmax.f32 %v463_v39, 0.0  ;;  %v429_v36 = vpop.xlane.xlu0 %428  ;;  %v592_v39 = vsel %vm589_vm15, %v591_v45, %v587_v9  ;;  %v445_v45 = vperm.slane %v1376_v4, 0  ;;  %vm1608_vm13 = vmor %vm614_vm12, %vm615_vm10 }
 0x1aa   : > { %v459_v30 = vmul.f32 2.0, %v429_v36  ;;  %vm1572_vm9 = vcmp.eq.f32.partialorder %v543_v37, 8.507059e+37  ;;  %v635_v37 = vand.u32 2147483648, %v1450_v22 }
 0x1ab   : > { %v497_v13 = vmul.f32 2.0, %v473_v15  ;;  %v495_v23 = vmul.f32 2.0, %v471_v47  ;;  %v452_v15 = vadd.f32 %v444_v59, %v1362_v11  ;;  %v577_v11 = vsel %vm1502_vm3, %v576_v5, %v572_v10 }
 0x1ac   : > { %v467_v42 = vsub.f32 %v451_v29, %v459_v30  ;;  %v426_v49 = vpop.xlane.xlu2 %425  ;;  %v440_v29 = vperm.slane %v1373_v28, 0  ;;  %v602_v30 = vsel %vm1539_vm5, %v1435_v7, %v598_v17  ;;  %v453_v17 = vadd.f32 %v445_v45, %v1376_v4 }
 0x1ad   : > { %v1452_v52 = vmul.f32 %v562_v57, %v497_v13  ;;  %v1454_v25 = vmul.f32 %v532_v21, %v495_v23  ;;  %v458_v55 = vmul.f32 2.0, %v426_v49  ;;  %v603_v13 = vand.u32 2147483647, %v1392_v34 }
 0x1ae   : > { %v475_v54 = vmax.f32 %v467_v42, 0.0  ;;  %v605_v23 = vand.u32 2147483648, %v1392_v34  ;;  %v536_v57 = vsub.f32 1.0, %v535_v0  ;;  %v448_v7 = vadd.f32 %v440_v29, %v1373_v28 }
 0x1af   : > { %v641_v32 = vadd.f32 2.0, %v1452_v52  ;;  %v639_v35 = vadd.f32 2.0, %v1454_v25  ;;  %v466_v62 = vsub.f32 %v450_v44, %v458_v55  ;;  %vm604_vm6 = vcmp.eq.f32.partialorder %v603_v13, 8.507059e+37 }
 0x1b0   : > { %v499_v61 = vmul.f32 2.0, %v475_v54  ;;  %v606_v34 = vor.u32 1.1754944e-38, %v605_v23  ;;  %v537_v26 = vmul.f32 %v1474_v51, %v536_v57 }
 0x1b1   : > { %v1467_v31 = vmul.f32 %v641_v32, %v1452_v52  ;;  %v1470_v6 = vmul.f32 %v639_v35, %v1454_v25  ;;  %v474_v33 = vmax.f32 %v466_v62, 0.0  ;;  %v432_v8 = vpop.xlane.xlu1 %431  ;;  %v610_v35 = vmul.f32 %v1490_v58, %v1423_v3  ;;  %v420_v43 = vpop.xlane.xlu0 %419 }
 0x1b2   : > { %v1509_v2 = vmul.f32 %v592_v39, %v499_v61  ;;  %v460_v47 = vmul.f32 2.0, %v432_v8  ;;  %v607_v44 = vsel %vm604_vm6, %v606_v34, %v602_v30  ;;  %v456_v49 = vmul.f32 2.0, %v420_v43 }
 0x1b3   : > { %1035 = vrsqrt.f32 %v1467_v31  ;;  %v498_v12 = vmul.f32 2.0, %v474_v33  ;;  %v611_v55 = vsub.f32 1.0, %v610_v35  ;;  %v538_v28 = vadd.f32 %v1474_v51, %v537_v26 }
 0x1b4   : > { %1037 = vrsqrt.f32 %v1470_v6  ;;  %v643_v50 = vadd.f32 2.0, %v1509_v2  ;;  %v468_v19 = vsub.f32 %v452_v15, %v460_v47  ;;  %v464_v56 = vsub.f32 %v448_v7, %v456_v49 }
 0x1b5   : > { %v1533_v36 = vmul.f32 %v577_v11, %v498_v12  ;;  %1039 = vrcp.f32 %v1450_v22  ;;  %v545_v39 = vand.u32 2147483648, %v1421_v1  ;;  %v612_v5 = vmul.f32 %v1490_v58, %v611_v55 }
 0x1b6   : > { %v1531_v14 = vmul.f32 %v643_v50, %v1509_v2  ;;  %v476_v32 = vmax.f32 %v468_v19, 0.0  ;;  %v472_v38 = vmax.f32 %v464_v56, 0.0  ;;  %v542_v13 = vsel %vm1583_vm11, %v1474_v51, %v538_v28 }
 0x1b7   : > { %v642_v41 = vadd.f32 2.0, %v1533_v36  ;;  %v618_v1 = vand.u32 2147483647, %v1423_v3  ;;  %v613_v4 = vadd.f32 %v1490_v58, %v612_v5  ;;  %v454_v26 = vadd.f32 %v446_v27, %v1387_v24 }
 0x1b8   : > { %1041 = vrsqrt.f32 %v1531_v14  ;;  %v500_v42 = vmul.f32 2.0, %v476_v32  ;;  %v435_v9 = vpop.xlane.xlu2 %434  ;;  %v496_v23 = vmul.f32 2.0, %v472_v38  ;;  %v633_v49 = vand.u32 2147483647, %v1450_v22 }
 0x1b9   : > { %v1517_v46 = vpop.eup %1035  ;;  %v1557_v53 = vmul.f32 %v642_v41, %v1533_v36  ;;  %v461_v63 = vmul.f32 2.0, %v435_v9  ;;  %vm1612_vm14 = vcmp.eq.f32.partialorder %v618_v1, 8.507059e+37  ;;  %v438_v55 = vpop.xlane.xlu0 %437  ;;  %vm686_vm0 = vcmp.eq.f32.partialorder %v1467_v31, inf }
 0x1ba   : > { %v1522_v48 = vpop.eup %1037  ;;  %v680_v18 = vmul.f32 %v1517_v46, %v1467_v31  ;;  %v1559_v54 = vmul.f32 %v607_v44, %v500_v42  ;;  %vm662_vm2 = vcmp.eq.f32.partialorder %v1470_v6, inf  ;;  %vm664_vm3 = vcmp.eq.f32.partialorder %v1470_v6, 0.0 }
 0x1bb   : > { %v656_v21 = vmul.f32 %v1522_v48, %v1470_v6  ;;  %v1564_v59 = vpop.eup %1039  ;;  %1043 = vrsqrt.f32 %v1557_v53  ;;  %v469_v11 = vsub.f32 %v453_v17, %v461_v63  ;;  %vm688_vm4 = vcmp.eq.f32.partialorder %v1467_v31, 0.0 }
 0x1bc   : > { %v681_v20 = vmul.f32 %v1517_v46, %v680_v18  ;;  %v644_v62 = vadd.f32 2.0, %v1559_v54  ;;  %v625_v47 = vmul.f32 %v1564_v59, %v1450_v22  ;;  %v546_v18 = vor.u32 1.1754944e-38, %v545_v39 }
 0x1bd   : > { %v657_v40 = vmul.f32 %v1522_v48, %v656_v21  ;;  %v620_v21 = vand.u32 2147483648, %v1423_v3  ;;  %v477_v41 = vmax.f32 %v469_v11, 0.0  ;;  %vm630_vm15 = vweird.f32 %v1564_v59 }
 0x1be   : > { %v682_v60 = vmul.f32 0.5, %v681_v20  ;;  %v1042_v61 = vpop.eup %1041  ;;  %v1579_v8 = vmul.f32 %v644_v62, %v1559_v54  ;;  %v547_v51 = vsel %vm1572_vm9, %v546_v18, %v542_v13  ;;  %v617_v3 = vsel %vm1608_vm13, %v1490_v58, %v613_v4  ;;  %vm1655_vm5 = vmor %vm629_vm1, %vm630_vm15 }
 0x1bf   : > { %v658_v16 = vmul.f32 0.5, %v657_v40  ;;  %v704_v0 = vmul.f32 %v1042_v61, %v1531_v14  ;;  %v1603_v35 = vmul.f32 %v547_v51, %v496_v23  ;;  %v626_v40 = vsub.f32 1.0, %v625_v47 }
 0x1c0   : > { %v683_v50 = vsub.f32 1.5, %v682_v60  ;;  %1045 = vrsqrt.f32 %v1579_v8  ;;  %v621_v42 = vor.u32 1.1754944e-38, %v620_v21  ;;  %v501_v60 = vmul.f32 2.0, %v477_v41 }
 0x1c1   : > { %v659_v33 = vsub.f32 1.5, %v658_v16  ;;  %v705_v12 = vmul.f32 %v1042_v61, %v704_v0  ;;  %v1044_v19 = vpop.eup %1043  ;;  %v640_v58 = vadd.f32 2.0, %v1603_v35  ;;  %v627_v56 = vmul.f32 %v1564_v59, %v626_v40 }
 0x1c2   : > { %v692_v30 = vmul.f32 %v1044_v19, %v1557_v53  ;;  %v684_v32 = vmul.f32 %v1517_v46, %v683_v50  ;;  %v622_v45 = vsel %vm1612_vm14, %v621_v42, %v617_v3  ;;  %v462_v39 = vmul.f32 2.0, %v438_v55 }
 0x1c3   : > { %v706_v57 = vmul.f32 0.5, %v705_v12  ;;  %v660_v29 = vmul.f32 %v1522_v48, %v659_v33  ;;  %v1636_v62 = vmul.f32 %v640_v58, %v1603_v35  ;;  %v1640_v10 = vmul.f32 %v622_v45, %v501_v60 }
 0x1c4   : > { %v693_v34 = vmul.f32 %v1044_v19, %v692_v30  ;;  %v685_v9 = vmul.f32 %v684_v32, %v1467_v31  ;;  %v665_v33 = vand.u32 2147483648, %v1470_v6  ;;  %v628_v15 = vadd.f32 %v1564_v59, %v627_v56 }
 0x1c5   : > { %v707_v46 = vsub.f32 1.5, %v706_v57  ;;  %v661_v44 = vmul.f32 %v660_v29, %v1470_v6  ;;  %1047 = vrsqrt.f32 %v1636_v62  ;;  %v470_v50 = vsub.f32 %v454_v26, %v462_v39 }
 0x1c6   : > { %v1621_v43 = vpop.eup %1045  ;;  %v694_v7 = vmul.f32 0.5, %v693_v34  ;;  %v687_v5 = vsel %vm686_vm0, %v1467_v31, %v685_v9  ;;  %v645_v18 = vadd.f32 2.0, %v1640_v10  ;;  %v632_v22 = vsel %vm1655_vm5, %v1564_v59, %v628_v15 }
 0x1c7   : > { %v716_v16 = vmul.f32 %v1621_v43, %v1579_v8  ;;  %v708_v28 = vmul.f32 %v1042_v61, %v707_v46  ;;  %v663_v38 = vsel %vm662_vm2, %v1470_v6, %v661_v44  ;;  %v689_v61 = vand.u32 2147483648, %v1467_v31 }
 0x1c8   : > { %v695_v24 = vsub.f32 1.5, %v694_v7  ;;  %v666_v17 = vsel %vm664_vm3, %v665_v33, %v663_v38  ;;  %vm1662_vm6 = vcmp.eq.f32.partialorder %v633_v49, 8.507059e+37  ;;  %v636_v6 = vor.u32 1.1754944e-38, %v635_v37 }
 0x1c9   : > { %v717_v0 = vmul.f32 %v1621_v43, %v716_v16  ;;  %v709_v47 = vmul.f32 %v708_v28, %v1531_v14  ;;  %v690_v12 = vsel %vm688_vm4, %v689_v61, %v687_v5  ;;  %v1667_v11 = vadd.f32 %v666_v17, %v1454_v25 }
 0x1ca   : > { %v696_v63 = vmul.f32 %v1044_v19, %v695_v24  ;;  %vm710_vm7 = vcmp.eq.f32.partialorder %v1531_v14, inf  ;;  %v713_v19 = vand.u32 2147483648, %v1531_v14  ;;  %v1672_v57 = vmul.f32 %v645_v18, %v1640_v10 }
 0x1cb   : > { %v718_v23 = vmul.f32 0.5, %v717_v0  ;;  %v1048_v4 = vpop.eup %1047  ;;  %v1675_v21 = vadd.f32 %v690_v12, %v1452_v52  ;;  %v711_v59 = vsel %vm710_vm7, %v1531_v14, %v709_v47  ;;  %vm698_vm8 = vcmp.eq.f32.partialorder %v1557_v53, inf }
 0x1cc   : > { %v697_v13 = vmul.f32 %v696_v63, %v1557_v53  ;;  %v478_v27 = vmax.f32 %v470_v50, 0.0  ;;  %v668_v30 = vmul.f32 %v1048_v4, %v1636_v62  ;;  %1049 = vrsqrt.f32 %v1672_v57 }
 0x1cd   : > { %v719_v25 = vsub.f32 1.5, %v718_v23  ;;  %v839_v51 = vlaneseq  ;;  %vm712_vm9 = vcmp.eq.f32.partialorder %v1531_v14, 0.0  ;;  %vm700_vm10 = vcmp.eq.f32.partialorder %v1557_v53, 0.0 }
 0x1ce   : > { %v699_v29 = vsel %vm698_vm8, %v1557_v53, %v697_v13  ;;  %v701_v52 = vand.u32 2147483648, %v1557_v53  ;;  %v759_v32 = vadd.f32 1.0, %v1667_v11  ;;  %v714_v40 = vsel %vm712_vm9, %v713_v19, %v711_v59 }
 0x1cf   : > { %v669_v34 = vmul.f32 %v1048_v4, %v668_v30  ;;  %v502_v20 = vmul.f32 2.0, %v478_v27  ;;  %v777_v48 = vadd.f32 1.0, %v1675_v21  ;;  %v637_v46 = vsel %vm1662_vm6, %v636_v6, %v632_v22 }
 0x1d0   : > { %v702_v41 = vsel %vm700_vm10, %v701_v52, %v699_v29  ;;  %v720_v3 = vmul.f32 %v1621_v43, %v719_v25  ;;  %v1693_v14 = vadd.f32 %v714_v40, %v1509_v2  ;;  %v1695_v44 = vand.u32 127, %v839_v51 }
 0x1d1   : > { %v670_v42 = vmul.f32 0.5, %v669_v34  ;;  %v1690_v26 = vmul.f32 %v637_v46, %v502_v20  ;;  %1051 = vlog2.f32 %v759_v32  ;;  %v1698_v7 = vadd.f32 %v702_v41, %v1533_v36 }
 0x1d2   : > { %v1050_v53 = vpop.eup %1049  ;;  %1053 = vlog2.f32 %v777_v48  ;;  %vm722_vm11 = vcmp.eq.f32.partialorder %v1579_v8, inf  ;;  %v762_v55 = vmul.f32 -0.5, %v1667_v11  ;;  %v721_v2 = vmul.f32 %v720_v3, %v1579_v8 }
 0x1d3   : > { %v671_v49 = vsub.f32 1.5, %v670_v42  ;;  %v728_v37 = vmul.f32 %v1050_v53, %v1672_v57  ;;  %v646_v43 = vadd.f32 2.0, %v1690_v26  ;;  %vm724_vm12 = vcmp.eq.f32.partialorder %v1579_v8, 0.0 }
 0x1d4   : > { %v795_v16 = vadd.f32 1.0, %v1693_v14  ;;  %v725_v36 = vand.u32 2147483648, %v1579_v8  ;;  %v780_v24 = vmul.f32 -0.5, %v1675_v21  ;;  %v765_v45 = vand.u32 2147483647, %v1667_v11 }
 0x1d5   : > { %v672_v9 = vmul.f32 %v1048_v4, %v671_v49  ;;  %v729_v58 = vmul.f32 %v1050_v53, %v728_v37  ;;  %v1709_v56 = vmul.f32 %v646_v43, %v1690_v26  ;;  %v786_v60 = vadd.f32 1.0, %v1698_v7 }
 0x1d6   : > { %vm674_vm13 = vcmp.eq.f32.partialorder %v1636_v62, inf  ;;  %v677_v39 = vand.u32 2147483648, %v1636_v62  ;;  %v763_v0 = vadd.f32 1.0, %v762_v55  ;;  %v723_v5 = vsel %vm722_vm11, %v1579_v8, %v721_v2 }
 0x1d7   : > { %v673_v28 = vmul.f32 %v672_v9, %v1636_v62  ;;  %v730_v38 = vmul.f32 0.5, %v729_v58  ;;  %1055 = vrsqrt.f32 %v1709_v56  ;;  %v1052_v63 = vpop.eup %1051  ;;  %vm676_vm14 = vcmp.eq.f32.partialorder %v1636_v62, 0.0 }
 0x1d8   : > { %v1054_v15 = vpop.eup %1053  ;;  %v783_v61 = vand.u32 2147483647, %v1675_v21  ;;  %1057 = vlog2.f32 %v795_v16  ;;  %v781_v50 = vadd.f32 1.0, %v780_v24  ;;  %vm1724_vm15 = vcmp.lt.f32.partialorder %v765_v45, 0.0004427343 }
 0x1d9   : > { %v675_v33 = vsel %vm674_vm13, %v1636_v62, %v673_v28  ;;  %v731_v47 = vsub.f32 1.5, %v730_v38  ;;  %1059 = vlog2.f32 %v786_v60  ;;  %v761_v23 = vmul.f32 0.6931472, %v1052_v63 }
 0x1da   : > { %v678_v17 = vsel %vm676_vm14, %v677_v39, %v675_v33  ;;  %v798_v18 = vmul.f32 -0.5, %v1693_v14  ;;  %v726_v62 = vsel %vm724_vm12, %v725_v36, %v723_v5  ;;  %v779_v22 = vmul.f32 0.6931472, %v1054_v15 }
 0x1db   : > { %v752_v13 = vadd.f32 %v678_v17, %v1603_v35  ;;  %v732_v1 = vmul.f32 %v1050_v53, %v731_v47  ;;  %v764_v31 = vmul.f32 %v763_v0, %v1667_v11  ;;  %v789_v6 = vmul.f32 -0.5, %v1698_v7 }
 0x1dc   : > { %v801_v59 = vand.u32 2147483647, %v1693_v14  ;;  %vm734_vm0 = vcmp.eq.f32.partialorder %v1672_v57, inf  ;;  %v1738_v35 = vadd.f32 %v726_v62, %v1559_v54  ;;  %v737_v8 = vand.u32 2147483648, %v1672_v57 }
 0x1dd   : > { %v768_v19 = vadd.f32 1.0, %v752_v13  ;;  %v1056_v4 = vpop.eup %1055  ;;  %v771_v27 = vmul.f32 -0.5, %v752_v13  ;;  %v733_v29 = vmul.f32 %v732_v1, %v1672_v57  ;;  %v767_v30 = vsel %vm1724_vm15, %v764_v31, %v761_v23 }
 0x1de   : > { %v740_v25 = vmul.f32 %v1056_v4, %v1709_v56  ;;  %v1058_v11 = vpop.eup %1057  ;;  %v799_v51 = vadd.f32 1.0, %v798_v18  ;;  %vm736_vm2 = vcmp.eq.f32.partialorder %v1672_v57, 0.0  ;;  %v790_v40 = vadd.f32 1.0, %v789_v6 }
 0x1df   : > { %1061 = vlog2.f32 %v768_v19  ;;  %v735_v52 = vsel %vm734_vm0, %v1672_v57, %v733_v29  ;;  %v1060_v32 = vpop.eup %1059  ;;  %v792_v34 = vand.u32 2147483647, %v1698_v7  ;;  %v782_v48 = vmul.f32 %v781_v50, %v1675_v21 }
 0x1e0   : > { %v738_v54 = vsel %vm736_vm2, %v737_v8, %v735_v52  ;;  %v741_v20 = vmul.f32 %v1056_v4, %v740_v25  ;;  %vm1748_vm3 = vcmp.lt.f32.partialorder %v783_v61, 0.0004427343  ;;  %v772_v46 = vadd.f32 1.0, %v771_v27 }
 0x1e1   : > { %v1753_v3 = vadd.f32 %v738_v54, %v1640_v10  ;;  %v797_v42 = vmul.f32 0.6931472, %v1058_v11  ;;  %v804_v53 = vadd.f32 1.0, %v1738_v35  ;;  %v774_v57 = vand.u32 2147483647, %v752_v13 }
 0x1e2   : > { %v742_v49 = vmul.f32 0.5, %v741_v20  ;;  %v785_v37 = vsel %vm1748_vm3, %v782_v48, %v779_v22  ;;  %v841_v43 = vperm.slane %v767_v30, %v1695_v44  ;;  %vm1759_vm1 = vcmp.lt.f32.partialorder %v801_v59, 0.0004427343 }
 0x1e3   : > { %v788_v55 = vmul.f32 0.6931472, %v1060_v32  ;;  %v800_v9 = vmul.f32 %v799_v51, %v1693_v14  ;;  %v791_v10 = vmul.f32 %v790_v40, %v1698_v7  ;;  %vm1765_vm4 = vcmp.lt.f32.partialorder %v792_v34, 0.0004427343 }
 0x1e4   : > { %v743_v36 = vsub.f32 1.5, %v742_v49  ;;  %v807_v58 = vmul.f32 -0.5, %v1738_v35  ;;  %v773_v45 = vmul.f32 %v772_v46, %v752_v13  ;;  %v813_v60 = vadd.f32 1.0, %v1753_v3 }
 0x1e5   : > { %v1062_v2 = vpop.eup %1061  ;;  %1063 = vlog2.f32 %v804_v53  ;;  %vm775_vm5 = vcmp.lt.f32.partialorder %v774_v57, 0.0004427343  ;;  %v803_v39 = vsel %vm1759_vm1, %v800_v9, %v797_v42  ;;  %v794_v7 = vsel %vm1765_vm4, %v791_v10, %v788_v55 }
 0x1e6   : > { %v770_v24 = vmul.f32 0.6931472, %v1062_v2  ;;  %v744_v28 = vmul.f32 %v1056_v4, %v743_v36  ;;  %v843_v38 = vperm.slane %v785_v37, %v1695_v44  ;;  %vm849_vm6 = vcmask 1041409  }
 0x1e7   : > { %vm746_vm7 = vcmp.eq.f32.partialorder %v1709_v56, inf  ;;  %vm851_vm8 = vcmask 1042434   ;;  %1065 = vlog2.f32 %v813_v60  ;;  %vm748_vm9 = vcmp.eq.f32.partialorder %v1709_v56, 0.0 }
 0x1e8   : > { %v776_v14 = vsel %vm775_vm5, %v773_v45, %v770_v24  ;;  %v745_v0 = vmul.f32 %v744_v28, %v1709_v56  ;;  %v749_v5 = vand.u32 2147483648, %v1709_v56  ;;  %vm853_vm10 = vcmask 1043459  }
 0x1e9   : > { %v842_v63 = vperm.slane %v776_v14, %v1695_v44  ;;  %v844_v15 = vperm.slane %v794_v7, %v1695_v44  ;;  %vm855_vm11 = vcmask 1044484   ;;  %v845_v47 = vperm.slane %v803_v39, %v1695_v44 }
 0x1ea   : > { %v747_v33 = vsel %vm746_vm7, %v1709_v56, %v745_v0  ;;  %v816_v13 = vmul.f32 -0.5, %v1753_v3  ;;  %v808_v62 = vadd.f32 1.0, %v807_v58  ;;  %v810_v56 = vand.u32 2147483647, %v1738_v35 }
 0x1eb   : > { %v850_v61 = vsel %vm849_vm6, %v842_v63, %v841_v43  ;;  %v750_v17 = vsel %vm748_vm9, %v749_v5, %v747_v33  ;;  %v1064_v12 = vpop.eup %1063  ;;  %v819_v27 = vand.u32 2147483647, %v1753_v3  ;;  %vm857_vm14 = vcmask 1045509  }
 0x1ec   : > { %v852_v50 = vsel %vm851_vm8, %v843_v38, %v850_v61  ;;  %v758_v23 = vadd.f32 %v750_v17, %v1690_v26  ;;  %v806_v6 = vmul.f32 0.6931472, %v1064_v12  ;;  %v817_v4 = vadd.f32 1.0, %v816_v13 }
 0x1ed   : > { %v854_v18 = vsel %vm853_vm10, %v844_v15, %v852_v50  ;;  %v1066_v31 = vpop.eup %1065  ;;  %v809_v59 = vmul.f32 %v808_v62, %v1738_v35  ;;  %vm811_vm12 = vcmp.lt.f32.partialorder %v810_v56, 0.0004427343  ;;  %vm820_vm13 = vcmp.lt.f32.partialorder %v819_v27, 0.0004427343 }
 0x1ee   : > { %v856_v1 = vsel %vm855_vm11, %v845_v47, %v854_v18  ;;  %v822_v22 = vadd.f32 1.0, %v758_v23  ;;  %v825_v19 = vmul.f32 -0.5, %v758_v23  ;;  %v815_v26 = vmul.f32 0.6931472, %v1066_v31 }
 0x1ef   : > { %v812_v29 = vsel %vm811_vm12, %v809_v59, %v806_v6  ;;  %v818_v25 = vmul.f32 %v817_v4, %v1753_v3  ;;  %v828_v11 = vand.u32 2147483647, %v758_v23  ;;  %vm859_vm0 = vcmask 1046534  }
 0x1f0   : > { %1067 = vlog2.f32 %v822_v22  ;;  %v826_v8 = vadd.f32 1.0, %v825_v19  ;;  %v846_v52 = vperm.slane %v812_v29, %v1695_v44  ;;  %vm861_vm2 = vcmask 1047559  }
 0x1f1   : > { %v821_v51 = vsel %vm820_vm13, %v818_v25, %v815_v26  ;;  %vm829_vm15 = vcmp.lt.f32.partialorder %v828_v11, 0.0004427343  ;;  %vm864_vm3 = vcmask 64512  }
 0x1f2   : > { %v827_v32 = vmul.f32 %v826_v8, %v758_v23  ;;  %v858_v40 = vsel %vm857_vm14, %v846_v52, %v856_v1  ;;  %v847_v54 = vperm.slane %v821_v51, %v1695_v44 }
 0x1f4   : > { %v860_v48 = vsel %vm859_vm0, %v847_v54, %v858_v40 }
 0x1f6   : > { %v1068_v30 = vpop.eup %1067 }
 0x1f7   : > { %v824_v35 = vmul.f32 0.6931472, %v1068_v30 }
 0x1f9   : > { %v830_v34 = vsel %vm829_vm15, %v827_v32, %v824_v35 }
 0x1fa   : > { %v848_v20 = vperm.slane %v830_v34, %v1695_v44 }
 0x1fc   : > { %v862_v41 = vsel %vm861_vm2, %v848_v20, %v860_v48 }
 0x1fd   : > { %v865_v46 = vsel %vm864_vm3, %v862_v41, 0.0 }
 0x1fe   : > { %866 = vst [vmem:[%s164_s16] sm:$0xff] %v865_v46 }
 0x1ff   : > { %1096 = shalt.err (!%p1093_p3)
}
 0x200   : > { %965 = dma.vmem_to_hbm [thread:$0]  (%p1188_p5), %s881_s17, 128, %s883_s19, %s868_s20  }
 0x201 PF: > { %p971_p4 = scmp.ge.s32.totalorder %s1131_s15, 2  ;;  %s894_s4 = sand.u32 1, %s1119_s12  }
 0x202   : > { %s895_s5 = scalar_lea.sflag [#allocation3], %s894_s4 }
 0x203   : > { %p968_p7 = pnand %p971_p4, %p1192_p6 }
 0x205   : > { %p969_p8 = pneg %p968_p7 }
 0x207   : > { %1114 = dma.done.wait (%p969_p8), %s895_s5, 128  }
 0x208   : > { %1116 = vsyncadd (%p969_p8), %s895_s5, 4294967168  ;;  %p13_p9 = scmp.ge.s32.totalorder %s1176_s18, 4   ;;  %s1878_s12 = smov %s1123_s13 }
 0x209   : > { %s1879_s13 = smov %s1127_s14  ;;  %s1880_s14 = smov %s1186_s21 }
 0x20a   : > { %s1881_s15 = smov %s1176_s18  ;;  %15 = sbr.rel (!%p13_p9) target bundleno = 3 (0x3), region = 67 }
 0x20f   :  { %901 = vsyncpa [#allocation3], 1 }
 0x210   :  { %903 = vsyncpa [#allocation3 + $0x1], 1 }

// kernel: tpu_custom_call.1
= control target key start
LH: loop header
LB: loop body
LE: loop exit
PB: predicated region body
PF: predicated region fallthrough
CT: control target
= control target key end

     0   :  { %8 = vsyncpa [#allocation3], 0  ;;  %s1832_s0 = inlined_call_operand.vmem [shape: f32[128,16], index: 0, kind: input, shape index: {}]   ;;  %s1833_s1 = inlined_call_operand.vmem [shape: bf16[16,32], index: 1, kind: input, shape index: {}]   ;;  %s1834_s2 = inlined_call_operand.vmem [shape: f32[1,32], index: 2, kind: input, shape index: {}]   ;;  %s1835_s3 = inlined_call_operand.hbm [shape: f32[16,128], index: 3, kind: output, shape index: {}]  }
   0x1   :  { %10 = vsyncpa [#allocation3 + $0x1], 0  ;;  %s1153_s12 = smov 0   ;;  %s1155_s13 = smov 0  }
   0x2   :  { %s1157_s14 = smov 0   ;;  %s1159_s15 = smov 0  }
   0x3 LB: > { %s941_s16 = sadd.s32 4294967295, %s1131_s15   ;;  %s942_s17 = sadd.s32 4294967294, %s1131_s15   ;;  %s1131_s15 = sphi %s1159_s15, %s1881_s15   ;;  %s1127_s14 = sphi %s1157_s14, %s1880_s14   ;;  %s1123_s13 = sphi %s1155_s13, %s1879_s13   ;;  %s1119_s12 = sphi %s1153_s12, %s1878_s12  }
   0x4   : > { %s1176_s18 = sadd.s32 1, %s1131_s15   ;;  %s91_s19 = sadd.s32 1, %s1127_s14 }
   0x5   : > { %s88_s20 = ssub.s32 %s1131_s15, %s1176_s18  ;;  %p101_p0 = scmp.ne.s32.totalorder %s1127_s14, %s1123_s13 }
   0x6   : > { %p89_p1 = scmp.eq.s32.totalorder %s88_s20, 0  ;;  %p102_p2 = scmp.eq.s32.totalorder %s941_s16, 1 }
   0x7   : > { %p107_p3 = scmp.ne.s32.totalorder %s1123_s13, %s1119_s12  ;;  %p108_p4 = scmp.eq.s32.totalorder %s942_s17, 1 }
   0x8   : > { %s1186_s21 = scalar_select %p89_p1, %s1127_s14, %s91_s19  }
   0x9   : > { %p1188_p5 = por %p102_p2, %p101_p0  ;;  %p1192_p6 = por %p108_p4, %p107_p3 }
   0xa   : > { %p945_p7 = scmp.ge.s32.totalorder %s1131_s15, 1  ;;  %p141_p8 = scmp.lt.s32.totalorder %s1131_s15, 3 }
   0xc   : > { %p142_p9 = pnand %p945_p7, %p141_p8 }
   0xd   : > { %s1201_s26 = sshll.u32 (!%p142_p9), %s941_s16, 3  ;;  %s162_s7 = sand.u32 (!%p142_p9), 1, %s1123_s13  }
   0xe   : > { %145 = sbr.rel (%p142_p9) target bundleno = 513 (0x201), region = 32  ;;  %p166_p10 = scmp.lt.s32.totalorder (!%p142_p9), %s1201_s26, 15 }
   0xf   : > { %s1792_s8 = sshll.u32 (!%p142_p9), %s162_s7, 3  ;;  %s878_s11 = scalar_lea.hbm (!%p142_p9), %s1835_s3, %s1201_s26 }
  0x10   : > { %s164_s16 = scalar_lea.vmem (!%p142_p9), [#allocation2], %s1792_s8  ;;  %s882_s19 = sshll.u32 (!%p142_p9), %s878_s11, 4  ;;  %s883_s19 = int_to_ptr.hbm [resolvable:$true] %s882_s19 }
  0x11   : > { %s880_s17 = sshll.u32 (!%p142_p9), %s164_s16, 4  ;;  %s868_s20 = scalar_lea.sflag (!%p142_p9), [#allocation3], %s162_s7  ;;  %s881_s17 = int_to_ptr.vmem [resolvable:$true] %s880_s17 }
  0x12   : > { %s1083_s24 = sshra.s32 (!%p142_p9), %s883_s19, 4  ;;  %s1084_s24 = int_to_ptr.hbm [resolvable:$true] %s1083_s24 }
  0x13   : > { %v961_v0 = vld [vmem:[%s1833_s1] sm:$0xff]  ;;  %s167_s27 = scalar_select %p166_p10, %s1201_s26, 15  ;;  %vm196_vm0 = vcmask 130048   ;;  %vm246_vm1 = vcmask 261120  }
  0x14   : > { %216 = vmatpush.bf16.msra.mxu0 %v961_v0  ;;  %962 = vmatpush.bf16.msra.mxu1 %v961_v0  ;;  %v1004_v13 = vld [vmem:[%s1834_s2] ss:$0 sm:$0xff]  ;;  %s1085_s25 = scalar_lea.hbm %s1084_s24, 8  ;;  %p1090_p0 = scmp.lt.s32.totalorder %s1084_s24, %s1835_s3 }
  0x15   : > { %963 = vmatpush.bf16.msra.mxu2 %v961_v0  ;;  %964 = vmatpush.bf16.msra.mxu3 %v961_v0  ;;  %s948_s28 = sshll.u32 %s167_s27, 3  ;;  %p1086_p11 = scmp.ne.s32.totalorder %s1084_s24, %s1085_s25 }
  0x16   : > { %s169_s4 = scalar_lea.vmem %s1832_s0, %s948_s28  ;;  %s1089_s28 = scalar_lea.hbm %s1835_s3, 16 }
  0x17   : > { %v172_v1 = vld [vmem:[%s169_s4] sm:$0xff]  ;;  %v173_v2 = vld [vmem:[%s169_s4 + $0x8] sm:$0xff]  ;;  %v174_v3 = vld [vmem:[%s169_s4 + $0x10] sm:$0xff]  ;;  %p1087_p12 = pnand %p1086_p11, %p1188_p5  ;;  %p1091_p1 = scmp.lt.s32.totalorder %s1089_s28, %s1085_s25 }
  0x18   : > { %v180_v4 = vpack.c.bf16 %v173_v2, %v172_v1  ;;  %v175_v5 = vld [vmem:[%s169_s4 + $0x18] sm:$0xff]  ;;  %v176_v6 = vld [vmem:[%s169_s4 + $0x20] sm:$0xff]  ;;  %v177_v7 = vld [vmem:[%s169_s4 + $0x28] sm:$0xff] }
  0x19   : > { %v181_v8 = vpack.c.bf16 %v175_v5, %v174_v3  ;;  %v182_v9 = vpack.c.bf16 %v177_v7, %v176_v6  ;;  %v178_v10 = vld [vmem:[%s169_s4 + $0x30] sm:$0xff]  ;;  %v179_v11 = vld [vmem:[%s169_s4 + $0x38] sm:$0xff]  ;;  %p1088_p13 = pneg %p1087_p12  ;;  %p1092_p2 = por %p1091_p1, %p1090_p0 }
  0x1a   : > { %953 = vmatmul.msk.bf16.vlgmr.msra.gmra.mxu0 %vm196_vm0, %v180_v4  ;;  %v183_v12 = vpack.c.bf16 %v179_v11, %v178_v10 }
  0x1b   : > { %954 = vmatmul.msk.bf16.vlgmr.msra.gmra.mxu1 %vm196_vm0, %v181_v8  ;;  %955 = vmatmul.msk.bf16.vlgmr.msra.gmra.mxu2 %vm196_vm0, %v182_v9  ;;  %p1093_p3 = pnand %p1092_p2, %p1088_p13 }
  0x1c   : > { %956 = vmatmul.msk.bf16.vlgmr.msra.gmra.mxu3 %vm196_vm0, %v183_v12 }
  0x97   : > { %v218_v14 = vpop.f32.mrf.mxu0 }
  0x98   : > { %v1211_v15 = vadd.f32 %v1004_v13, %v218_v14  ;;  %v223_v16 = vpop.f32.mrf.mxu1 }
  0x99   : > { %v1213_v17 = vadd.f32 %v1004_v13, %v223_v16 }
  0x9a   : > { %v238_v18 = vmul.f32 %v1211_v15, %v1211_v15 }
  0x9b   : > { %v240_v19 = vmul.f32 %v1213_v17, %v1213_v17 }
  0x9c   : > { %v247_v20 = vsel %vm246_vm1, %v238_v18, 0.0 }
  0x9d   : > { %v253_v21 = vsel %vm246_vm1, %v240_v19, 0.0  ;;  %248 = vadd.xlane.f32.xlu0 %v247_v20 }
  0x9e   : > { %v228_v22 = vpop.f32.mrf.mxu2  ;;  %254 = vadd.xlane.f32.xlu1 %v253_v21 }
  0x9f   : > { %v1221_v23 = vadd.f32 %v1004_v13, %v228_v22  ;;  %v233_v24 = vpop.f32.mrf.mxu3  ;;  %v220_v25 = vpop.f32.mrf.mxu0 }
  0xa0   : > { %v1223_v26 = vadd.f32 %v1004_v13, %v220_v25  ;;  %v225_v27 = vpop.f32.mrf.mxu1  ;;  %v1234_v33 = vadd.f32 %v1004_v13, %v233_v24 }
  0xa1   : > { %v1225_v28 = vadd.f32 %v1004_v13, %v225_v27  ;;  %v242_v29 = vmul.f32 %v1221_v23, %v1221_v23 }
  0xa2   : > { %v239_v30 = vmul.f32 %v1223_v26, %v1223_v26  ;;  %v244_v40 = vmul.f32 %v1234_v33, %v1234_v33 }
  0xa3   : > { %v259_v31 = vsel %vm246_vm1, %v242_v29, 0.0  ;;  %v241_v32 = vmul.f32 %v1225_v28, %v1225_v28 }
  0xa4   : > { %260 = vadd.xlane.f32.xlu2 %v259_v31  ;;  %v250_v34 = vsel %vm246_vm1, %v239_v30, 0.0  ;;  %v265_v44 = vsel %vm246_vm1, %v244_v40, 0.0 }
  0xa5   : > { %v256_v35 = vsel %vm246_vm1, %v241_v32, 0.0  ;;  %251 = vadd.xlane.f32.xlu0 %v250_v34 }
  0xa6   : > { %v230_v36 = vpop.f32.mrf.mxu2  ;;  %257 = vadd.xlane.f32.xlu1 %v256_v35 }
  0xa7   : > { %v1238_v37 = vadd.f32 %v1004_v13, %v230_v36  ;;  %v235_v38 = vpop.f32.mrf.mxu3 }
  0xa8   : > { %v1240_v39 = vadd.f32 %v1004_v13, %v235_v38 }
  0xa9   : > { %v243_v41 = vmul.f32 %v1238_v37, %v1238_v37 }
  0xaa   : > { %v245_v42 = vmul.f32 %v1240_v39, %v1240_v39 }
  0xab   : > { %v262_v43 = vsel %vm246_vm1, %v243_v41, 0.0 }
  0xac   : > { %263 = vadd.xlane.f32.xlu2 %v262_v43  ;;  %v268_v45 = vsel %vm246_vm1, %v245_v42, 0.0 }
  0xad   : > { %266 = vadd.xlane.f32.xlu0 %v265_v44 }
  0xae   : > { %269 = vadd.xlane.f32.xlu1 %v268_v45 }
 0x110   : > { %v1251_v46 = vpop.xlane.xlu0 %248 }
 0x111   : > { %v1253_v47 = vpop.xlane.xlu1 %254  ;;  %v279_v48 = vadd.f32 1e-30, %v1251_v46  ;;  %vm271_vm14 = vcmp.gt.f32.partialorder %v1251_v46, 0.99998 }
 0x112   : > { %v281_v49 = vadd.f32 1e-30, %v1253_v47  ;;  %vm273_vm13 = vcmp.gt.f32.partialorder %v1253_v47, 0.99998 }
 0x113   : > { %1005 = vrsqrt.f32 %v279_v48  ;;  %vm293_vm4 = vweird.f32 %v279_v48 }
 0x114   : > { %1007 = vrsqrt.f32 %v281_v49  ;;  %vm313_vm5 = vweird.f32 %v281_v49 }
 0x117   : > { %v1257_v50 = vpop.xlane.xlu2 %260 }
 0x118   : > { %v283_v51 = vadd.f32 1e-30, %v1257_v50  ;;  %v1260_v52 = vpop.xlane.xlu0 %251 }
 0x119   : > { %v1006_v53 = vpop.eup %1005  ;;  %v1263_v54 = vadd.f32 1e-30, %v1260_v52  ;;  %v1265_v57 = vpop.xlane.xlu1 %257 }
 0x11a   : > { %v1008_v55 = vpop.eup %1007  ;;  %v288_v56 = vmul.f32 %v1006_v53, %v279_v48  ;;  %1009 = vrsqrt.f32 %v283_v51  ;;  %v282_v61 = vadd.f32 1e-30, %v1265_v57  ;;  %vm294_vm2 = vweird.f32 %v1006_v53 }
 0x11b   : > { %v308_v58 = vmul.f32 %v1008_v55, %v281_v49  ;;  %1011 = vrsqrt.f32 %v1263_v54  ;;  %vm314_vm3 = vweird.f32 %v1008_v55  ;;  %vm1278_vm6 = vmor %vm293_vm4, %vm294_vm2  ;;  %vm333_vm9 = vweird.f32 %v283_v51 }
 0x11c   : > { %v289_v59 = vmul.f32 %v1006_v53, %v288_v56  ;;  %1013 = vrsqrt.f32 %v282_v61  ;;  %vm315_vm7 = vmor %vm313_vm5, %vm314_vm3  ;;  %vm303_vm15 = vweird.f32 %v1263_v54  ;;  %vm323_vm0 = vweird.f32 %v282_v61 }
 0x11d   : > { %v309_v60 = vmul.f32 %v1008_v55, %v308_v58  ;;  %vm275_vm4 = vcmp.gt.f32.partialorder %v1257_v50, 0.99998  ;;  %vm274_vm5 = vcmp.gt.f32.partialorder %v1265_v57, 0.99998 }
 0x11e   : > { %v290_v62 = vmul.f32 0.5, %v289_v59 }
 0x11f   : > { %v310_v63 = vmul.f32 0.5, %v309_v60  ;;  %v1269_v4 = vpop.xlane.xlu2 %263 }
 0x120   : > { %v1010_v0 = vpop.eup %1009  ;;  %v291_v1 = vsub.f32 1.5, %v290_v62  ;;  %v1276_v10 = vadd.f32 1e-30, %v1269_v4  ;;  %v1298_v36 = vpop.xlane.xlu0 %266 }
 0x121   : > { %v311_v2 = vsub.f32 1.5, %v310_v63  ;;  %v328_v3 = vmul.f32 %v1010_v0, %v283_v51  ;;  %v1271_v5 = vpop.eup %1011  ;;  %vm334_vm8 = vweird.f32 %v1010_v0  ;;  %v1285_v20 = vpop.xlane.xlu1 %269  ;;  %v1310_v45 = vadd.f32 1e-30, %v1298_v36 }
 0x122   : > { %v292_v6 = vmul.f32 %v1006_v53, %v291_v1  ;;  %v298_v9 = vmul.f32 %v1271_v5, %v1263_v54  ;;  %v1014_v11 = vpop.eup %1013  ;;  %1015 = vrsqrt.f32 %v1276_v10  ;;  %vm1288_vm10 = vmor %vm333_vm9, %vm334_vm8  ;;  %v1293_v31 = vadd.f32 1e-30, %v1285_v20 }
 0x123   : > { %v329_v7 = vmul.f32 %v1010_v0, %v328_v3  ;;  %v312_v8 = vmul.f32 %v1008_v55, %v311_v2  ;;  %v318_v14 = vmul.f32 %v1014_v11, %v282_v61  ;;  %vm304_vm11 = vweird.f32 %v1271_v5 }
 0x124   : > { %v299_v16 = vmul.f32 %v1271_v5, %v298_v9  ;;  %v296_v18 = vsel %vm1278_vm6, %v1006_v53, %v292_v6  ;;  %vm324_vm12 = vweird.f32 %v1014_v11  ;;  %1017 = vrsqrt.f32 %v1293_v31  ;;  %vm1305_vm2 = vmor %vm303_vm15, %vm304_vm11 }
 0x125   : > { %v330_v12 = vmul.f32 0.5, %v329_v7  ;;  %v316_v21 = vsel %vm315_vm7, %v1008_v55, %v312_v8  ;;  %v319_v22 = vmul.f32 %v1014_v11, %v318_v14  ;;  %v367_v34 = vmul.f32 0.99999, %v296_v18  ;;  %vm325_vm3 = vmor %vm323_vm0, %vm324_vm12 }
 0x126   : > { %v300_v24 = vmul.f32 0.5, %v299_v16  ;;  %v369_v32 = vmul.f32 0.99999, %v316_v21  ;;  %1019 = vrsqrt.f32 %v1310_v45  ;;  %vm272_vm7 = vcmp.gt.f32.partialorder %v1260_v52, 0.99998 }
 0x127   : > { %v331_v19 = vsub.f32 1.5, %v330_v12  ;;  %v320_v29 = vmul.f32 0.5, %v319_v22  ;;  %v375_v49 = vsel %vm271_vm14, %v367_v34, 1.0  ;;  %vm343_vm8 = vweird.f32 %v1276_v10 }
 0x128   : > { %v301_v30 = vsub.f32 1.5, %v300_v24  ;;  %v1016_v41 = vpop.eup %1015  ;;  %v377_v48 = vsel %vm273_vm13, %v369_v32, 1.0  ;;  %v383_v61 = vmul.f32 %v375_v49, %v1211_v15  ;;  %vm276_vm11 = vcmp.gt.f32.partialorder %v1269_v4, 0.99998 }
 0x129   : > { %v332_v25 = vmul.f32 %v1010_v0, %v331_v19  ;;  %v321_v38 = vsub.f32 1.5, %v320_v29  ;;  %v338_v51 = vmul.f32 %v1016_v41, %v1276_v10  ;;  %v385_v60 = vmul.f32 %v377_v48, %v1213_v17 }
 0x12a   : > { %v302_v40 = vmul.f32 %v1271_v5, %v301_v30  ;;  %v1018_v58 = vpop.eup %1017  ;;  %vm344_vm6 = vweird.f32 %v1016_v41  ;;  %v399_v3 = vperm.slane %v383_v61, 0  ;;  %vm363_vm12 = vweird.f32 %v1293_v31 }
 0x12b   : > { %v336_v35 = vsel %vm1288_vm10, %v1010_v0, %v332_v25  ;;  %v322_v43 = vmul.f32 %v1014_v11, %v321_v38  ;;  %v339_v56 = vmul.f32 %v1016_v41, %v338_v51  ;;  %v358_v1 = vmul.f32 %v1018_v58, %v1293_v31  ;;  %vm345_vm9 = vmor %vm343_vm8, %vm344_vm6 }
 0x12c   : > { %v371_v42 = vmul.f32 0.99999, %v336_v35  ;;  %v306_v54 = vsel %vm1305_vm2, %v1271_v5, %v302_v40  ;;  %v401_v2 = vperm.slane %v385_v60, 0  ;;  %v1020_v9 = vpop.eup %1019  ;;  %v407_v17 = vmul.f32 %v399_v3, %v383_v61 }
 0x12d   : > { %v326_v53 = vsel %vm325_vm3, %v1014_v11, %v322_v43  ;;  %v368_v63 = vmul.f32 0.99999, %v306_v54  ;;  %v340_v0 = vmul.f32 0.5, %v339_v56  ;;  %v359_v6 = vmul.f32 %v1018_v58, %v358_v1 }
 0x12e   : > { %v370_v55 = vmul.f32 0.99999, %v326_v53  ;;  %v379_v59 = vsel %vm275_vm4, %v371_v42, 1.0  ;;  %v409_v15 = vmul.f32 %v401_v2, %v385_v60  ;;  %v348_v14 = vmul.f32 %v1020_v9, %v1310_v45 }
 0x12f   : > { %v341_v5 = vsub.f32 1.5, %v340_v0  ;;  %v387_v7 = vmul.f32 %v379_v59, %v1221_v23  ;;  %v376_v11 = vsel %vm272_vm7, %v368_v63, 1.0  ;;  %v360_v13 = vmul.f32 0.5, %v359_v6 }
 0x130   : > { %v378_v62 = vsel %vm274_vm5, %v370_v55, 1.0  ;;  %vm364_vm10 = vweird.f32 %v1018_v58  ;;  %v421_v16 = vsel %vm246_vm1, %v409_v15, 0.0  ;;  %v415_v23 = vsel %vm246_vm1, %v407_v17, 0.0 }
 0x131   : > { %v386_v8 = vmul.f32 %v378_v62, %v1225_v28  ;;  %v342_v12 = vmul.f32 %v1016_v41, %v341_v5  ;;  %v403_v28 = vperm.slane %v387_v7, 0  ;;  %v361_v19 = vsub.f32 1.5, %v360_v13  ;;  %422 = vadd.xlane.f32.xlu1 %v421_v16  ;;  %416 = vadd.xlane.f32.xlu2 %v415_v23  ;;  %vm365_vm13 = vmor %vm363_vm12, %vm364_vm10 }
 0x132   : > { %v349_v21 = vmul.f32 %v1020_v9, %v348_v14  ;;  %v384_v25 = vmul.f32 %v376_v11, %v1223_v26  ;;  %vm354_vm14 = vweird.f32 %v1020_v9  ;;  %vm278_vm15 = vcmp.gt.f32.partialorder %v1285_v20, 0.99998 }
 0x133   : > { %v346_v18 = vsel %vm345_vm9, %v1016_v41, %v342_v12  ;;  %v402_v10 = vperm.slane %v386_v8, 0  ;;  %v411_v24 = vmul.f32 %v403_v28, %v387_v7  ;;  %v362_v27 = vmul.f32 %v1018_v58, %v361_v19 }
 0x134   : > { %v372_v22 = vmul.f32 0.99999, %v346_v18  ;;  %v350_v29 = vmul.f32 0.5, %v349_v21  ;;  %v400_v35 = vperm.slane %v384_v25, 0  ;;  %vm353_vm0 = vweird.f32 %v1310_v45 }
 0x135   : > { %v410_v30 = vmul.f32 %v402_v10, %v386_v8  ;;  %v427_v34 = vsel %vm246_vm1, %v411_v24, 0.0  ;;  %v366_v38 = vsel %vm365_vm13, %v1018_v58, %v362_v27  ;;  %vm355_vm2 = vmor %vm353_vm0, %vm354_vm14  ;;  %vm277_vm3 = vcmp.gt.f32.partialorder %v1298_v36, 0.99998 }
 0x136   : > { %v380_v32 = vsel %vm276_vm11, %v372_v22, 1.0  ;;  %v351_v40 = vsub.f32 1.5, %v350_v29  ;;  %428 = vadd.xlane.f32.xlu0 %v427_v34  ;;  %v374_v42 = vmul.f32 0.99999, %v366_v38  ;;  %v408_v48 = vmul.f32 %v400_v35, %v384_v25 }
 0x137   : > { %v388_v41 = vmul.f32 %v380_v32, %v1238_v37  ;;  %v424_v26 = vsel %vm246_vm1, %v410_v30, 0.0  ;;  %v393_v63 = vmin.f32 %v1253_v47, 0.99998  ;;  %v391_v0 = vmin.f32 %v1251_v46, 0.99998 }
 0x138   : > { %v352_v31 = vmul.f32 %v1020_v9, %v351_v40  ;;  %v382_v44 = vsel %vm278_vm15, %v374_v42, 1.0  ;;  %v418_v56 = vsel %vm246_vm1, %v408_v48, 0.0  ;;  %v1349_v6 = vmin.f32 %v1257_v50, 0.99998 }
 0x139   : > { %v404_v43 = vperm.slane %v388_v41, 0  ;;  %425 = vadd.xlane.f32.xlu2 %v424_v26  ;;  %v390_v53 = vmul.f32 %v382_v44, %v1240_v39  ;;  %v481_v1 = vsub.f32 1.0, %v393_v63  ;;  %v479_v2 = vsub.f32 1.0, %v391_v0 }
 0x13a   : > { %v356_v49 = vsel %vm355_vm2, %v1020_v9, %v352_v31  ;;  %v483_v8 = vsub.f32 1.0, %v1349_v6  ;;  %v1353_v9 = vmin.f32 %v1265_v57, 0.99998  ;;  %v1362_v11 = vmin.f32 %v1269_v4, 0.99998 }
 0x13b   : > { %v412_v51 = vmul.f32 %v404_v43, %v388_v41  ;;  %v373_v54 = vmul.f32 0.99999, %v356_v49  ;;  %v406_v58 = vperm.slane %v390_v53, 0  ;;  %v489_v3 = vmax.f32 %v481_v1, 1e-05 }
 0x13c   : > { %v487_v5 = vmax.f32 %v479_v2, 1e-05  ;;  %v491_v47 = vmax.f32 %v483_v8, 1e-05  ;;  %v482_v46 = vsub.f32 1.0, %v1353_v9  ;;  %v484_v13 = vsub.f32 1.0, %v1362_v11 }
 0x13d   : > { %v430_v37 = vsel %vm246_vm1, %v412_v51, 0.0  ;;  %v381_v55 = vsel %vm277_vm3, %v373_v54, 1.0  ;;  %v414_v60 = vmul.f32 %v406_v58, %v390_v53  ;;  %v1373_v28 = vmin.f32 %v1260_v52, 0.99998 }
 0x13e   : > { %431 = vadd.xlane.f32.xlu1 %v430_v37  ;;  %419 = vadd.xlane.f32.xlu0 %v418_v56  ;;  %v389_v45 = vmul.f32 %v381_v55, %v1234_v33  ;;  %v505_v33 = vperm.slane %v489_v3, 0  ;;  %v503_v7 = vperm.slane %v487_v5, 0  ;;  %v507_v50 = vperm.slane %v491_v47, 0 }
 0x13f   : > { %v436_v39 = vsel %vm246_vm1, %v414_v60, 0.0  ;;  %v490_v12 = vmax.f32 %v482_v46, 1e-05  ;;  %v492_v18 = vmax.f32 %v484_v13, 1e-05  ;;  %v480_v22 = vsub.f32 1.0, %v1373_v28 }
 0x140   : > { %v405_v59 = vperm.slane %v389_v45, 0  ;;  %v1355_v15 = vmul.f32 %v505_v33, %v489_v3  ;;  %v1357_v17 = vmul.f32 %v503_v7, %v487_v5  ;;  %v1370_v16 = vmul.f32 %v507_v50, %v491_v47 }
 0x141   : > { %v506_v23 = vperm.slane %v490_v12, 0  ;;  %v1376_v4 = vmin.f32 %v1298_v36, 0.99998  ;;  %v1387_v24 = vmin.f32 %v1285_v20, 0.99998  ;;  %v508_v52 = vperm.slane %v492_v18, 0 }
 0x142   : > { %v413_v61 = vmul.f32 %v405_v59, %v389_v45  ;;  %1021 = vrcp.f32 %v1355_v15  ;;  %v488_v29 = vmax.f32 %v480_v22, 1e-05  ;;  %v441_v32 = vperm.slane %v393_v63, 0 }
 0x143   : > { %1023 = vrcp.f32 %v1357_v17  ;;  %v1383_v10 = vmul.f32 %v506_v23, %v490_v12  ;;  %v485_v25 = vsub.f32 1.0, %v1376_v4  ;;  %v486_v30 = vsub.f32 1.0, %v1387_v24 }
 0x144   : > { %v433_v62 = vsel %vm246_vm1, %v413_v61, 0.0  ;;  %1025 = vrcp.f32 %v1370_v16  ;;  %v1392_v34 = vmul.f32 %v508_v52, %v492_v18  ;;  %v439_v20 = vperm.slane %v391_v0, 0 }
 0x145   : > { %434 = vadd.xlane.f32.xlu2 %v433_v62  ;;  %1027 = vrcp.f32 %v1383_v10  ;;  %v493_v35 = vmax.f32 %v485_v25, 1e-05  ;;  %v504_v42 = vperm.slane %v488_v29, 0  ;;  %v494_v26 = vmax.f32 %v486_v30, 1e-05 }
 0x146   : > { %437 = vadd.xlane.f32.xlu0 %v436_v39  ;;  %v449_v31 = vadd.f32 %v441_v32, %v393_v63  ;;  %1029 = vrcp.f32 %v1392_v34  ;;  %vm554_vm1 = vweird.f32 %v1355_v15  ;;  %v558_v51 = vand.u32 2147483647, %v1355_v15 }
 0x147   : > { %v509_v43 = vperm.slane %v493_v35, 0  ;;  %v447_v54 = vadd.f32 %v439_v20, %v391_v0  ;;  %v560_v45 = vand.u32 2147483648, %v1355_v15  ;;  %vm524_vm6 = vweird.f32 %v1357_v17 }
 0x148   : > { %v1366_v57 = vpop.eup %1021  ;;  %v528_v59 = vand.u32 2147483647, %v1357_v17  ;;  %v530_v60 = vand.u32 2147483648, %v1357_v17  ;;  %v1421_v1 = vmul.f32 %v504_v42, %v488_v29  ;;  %v510_v2 = vperm.slane %v494_v26, 0 }
 0x149   : > { %v1368_v14 = vpop.eup %1023  ;;  %v550_v19 = vmul.f32 %v1366_v57, %v1355_v15  ;;  %vm555_vm4 = vweird.f32 %v1366_v57  ;;  %v1423_v3 = vmul.f32 %v509_v43, %v493_v35  ;;  %vm1425_vm8 = vcmp.eq.f32.partialorder %v558_v51, 8.507059e+37 }
 0x14a   : > { %v520_v21 = vmul.f32 %v1368_v14, %v1357_v17  ;;  %v1394_v38 = vpop.eup %1025  ;;  %vm525_vm5 = vweird.f32 %v1368_v14  ;;  %vm1415_vm7 = vmor %vm554_vm1, %vm555_vm4  ;;  %v561_v46 = vor.u32 1.1754944e-38, %v560_v45  ;;  %vm529_vm10 = vcmp.eq.f32.partialorder %v528_v59, 8.507059e+37 }
 0x14b   : > { %v551_v36 = vsub.f32 1.0, %v550_v19  ;;  %v580_v44 = vmul.f32 %v1394_v38, %v1370_v16  ;;  %v1402_v48 = vpop.eup %1027  ;;  %vm1431_vm9 = vmor %vm524_vm6, %vm525_vm5  ;;  %v531_v50 = vor.u32 1.1754944e-38, %v530_v60  ;;  %v443_v12 = vperm.slane %v1349_v6, 0 }
 0x14c   : > { %v521_v27 = vsub.f32 1.0, %v520_v21  ;;  %v565_v0 = vmul.f32 %v1402_v48, %v1383_v10  ;;  %v1435_v7 = vpop.eup %1029  ;;  %1031 = vrcp.f32 %v1421_v1  ;;  %v1450_v22 = vmul.f32 %v510_v2, %v494_v26 }
 0x14d   : > { %v552_v40 = vmul.f32 %v1366_v57, %v551_v36  ;;  %v581_v63 = vsub.f32 1.0, %v580_v44  ;;  %1033 = vrcp.f32 %v1423_v3  ;;  %v451_v29 = vadd.f32 %v443_v12, %v1349_v6 }
 0x14e   : > { %v522_v41 = vmul.f32 %v1368_v14, %v521_v27  ;;  %v566_v19 = vsub.f32 1.0, %v565_v0  ;;  %v442_v27 = vperm.slane %v1353_v9, 0  ;;  %vm585_vm11 = vweird.f32 %v1394_v38 }
 0x14f   : > { %v553_v49 = vadd.f32 %v1366_v57, %v552_v40  ;;  %v582_v18 = vmul.f32 %v1394_v38, %v581_v63  ;;  %vm584_vm12 = vweird.f32 %v1370_v16  ;;  %v588_v43 = vand.u32 2147483647, %v1370_v16 }
 0x150   : > { %v523_v56 = vadd.f32 %v1368_v14, %v522_v41  ;;  %v567_v20 = vmul.f32 %v1402_v48, %v566_v19  ;;  %v590_v41 = vand.u32 2147483648, %v1370_v16  ;;  %v450_v44 = vadd.f32 %v442_v27, %v1353_v9  ;;  %vm1478_vm13 = vmor %vm584_vm12, %vm585_vm11 }
 0x151   : > { %v557_v8 = vsel %vm1415_vm7, %v1366_v57, %v553_v49  ;;  %v583_v40 = vadd.f32 %v1394_v38, %v582_v18  ;;  %vm570_vm14 = vweird.f32 %v1402_v48  ;;  %v444_v59 = vperm.slane %v1362_v11, 0 }
 0x152   : > { %v527_v17 = vsel %vm1431_vm9, %v1368_v14, %v523_v56  ;;  %v562_v57 = vsel %vm1425_vm8, %v561_v46, %v557_v8  ;;  %v595_v14 = vmul.f32 %v1435_v7, %v1392_v34  ;;  %v1474_v51 = vpop.eup %1031  ;;  %v568_v16 = vadd.f32 %v1402_v48, %v567_v20 }
 0x153   : > { %v532_v21 = vsel %vm529_vm10, %v531_v50, %v527_v17  ;;  %v587_v9 = vsel %vm1478_vm13, %v1394_v38, %v583_v40  ;;  %v575_v56 = vand.u32 2147483648, %v1383_v10  ;;  %v591_v45 = vor.u32 1.1754944e-38, %v590_v41 }
 0x154   : > { %v596_v26 = vsub.f32 1.0, %v595_v14  ;;  %vm589_vm15 = vcmp.eq.f32.partialorder %v588_v43, 8.507059e+37  ;;  %vm569_vm0 = vweird.f32 %v1383_v10  ;;  %vm599_vm1 = vweird.f32 %v1392_v34 }
 0x155   : > { %vm1498_vm2 = vmor %vm569_vm0, %vm570_vm14  ;;  %v535_v0 = vmul.f32 %v1474_v51, %v1421_v1  ;;  %v576_v5 = vor.u32 1.1754944e-38, %v575_v56  ;;  %vm600_vm4 = vweird.f32 %v1435_v7  ;;  %vm539_vm7 = vweird.f32 %v1421_v1 }
 0x156   : > { %v597_v60 = vmul.f32 %v1435_v7, %v596_v26  ;;  %vm1539_vm5 = vmor %vm599_vm1, %vm600_vm4  ;;  %vm540_vm8 = vweird.f32 %v1474_v51  ;;  %v446_v27 = vperm.slane %v1387_v24, 0  ;;  %vm614_vm12 = vweird.f32 %v1423_v3 }
 0x157   : > { %vm1583_vm11 = vmor %vm539_vm7, %vm540_vm8  ;;  %vm629_vm1 = vweird.f32 %v1450_v22 }
 0x158   : > { %v598_v17 = vadd.f32 %v1435_v7, %v597_v60 }
 0x1a4   : > { %v423_v53 = vpop.xlane.xlu1 %422  ;;  %v417_v37 = vpop.xlane.xlu2 %416 }
 0x1a5   : > { %v457_v55 = vmul.f32 2.0, %v423_v53  ;;  %v455_v58 = vmul.f32 2.0, %v417_v37  ;;  %v573_v37 = vand.u32 2147483647, %v1383_v10  ;;  %v572_v10 = vsel %vm1498_vm2, %v1402_v48, %v568_v16 }
 0x1a7   : > { %v465_v62 = vsub.f32 %v449_v31, %v457_v55  ;;  %v463_v39 = vsub.f32 %v447_v54, %v455_v58  ;;  %v1490_v58 = vpop.eup %1033  ;;  %vm1502_vm3 = vcmp.eq.f32.partialorder %v573_v37, 8.507059e+37  ;;  %v543_v37 = vand.u32 2147483647, %v1421_v1 }
 0x1a8   : > { %vm615_vm10 = vweird.f32 %v1490_v58 }
 0x1a9   : > { %v473_v15 = vmax.f32 %v465_v62, 0.0  ;;  %v471_v47 = vmax.f32 %v463_v39, 0.0  ;;  %v429_v36 = vpop.xlane.xlu0 %428  ;;  %v592_v39 = vsel %vm589_vm15, %v591_v45, %v587_v9  ;;  %v445_v45 = vperm.slane %v1376_v4, 0  ;;  %vm1608_vm13 = vmor %vm614_vm12, %vm615_vm10 }
 0x1aa   : > { %v459_v30 = vmul.f32 2.0, %v429_v36  ;;  %vm1572_vm9 = vcmp.eq.f32.partialorder %v543_v37, 8.507059e+37  ;;  %v635_v37 = vand.u32 2147483648, %v1450_v22 }
 0x1ab   : > { %v497_v13 = vmul.f32 2.0, %v473_v15  ;;  %v495_v23 = vmul.f32 2.0, %v471_v47  ;;  %v452_v15 = vadd.f32 %v444_v59, %v1362_v11  ;;  %v577_v11 = vsel %vm1502_vm3, %v576_v5, %v572_v10 }
 0x1ac   : > { %v467_v42 = vsub.f32 %v451_v29, %v459_v30  ;;  %v426_v49 = vpop.xlane.xlu2 %425  ;;  %v440_v29 = vperm.slane %v1373_v28, 0  ;;  %v602_v30 = vsel %vm1539_vm5, %v1435_v7, %v598_v17  ;;  %v453_v17 = vadd.f32 %v445_v45, %v1376_v4 }
 0x1ad   : > { %v1452_v52 = vmul.f32 %v562_v57, %v497_v13  ;;  %v1454_v25 = vmul.f32 %v532_v21, %v495_v23  ;;  %v458_v55 = vmul.f32 2.0, %v426_v49  ;;  %v603_v13 = vand.u32 2147483647, %v1392_v34 }
 0x1ae   : > { %v475_v54 = vmax.f32 %v467_v42, 0.0  ;;  %v605_v23 = vand.u32 2147483648, %v1392_v34  ;;  %v536_v57 = vsub.f32 1.0, %v535_v0  ;;  %v448_v7 = vadd.f32 %v440_v29, %v1373_v28 }
 0x1af   : > { %v641_v32 = vadd.f32 2.0, %v1452_v52  ;;  %v639_v35 = vadd.f32 2.0, %v1454_v25  ;;  %v466_v62 = vsub.f32 %v450_v44, %v458_v55  ;;  %vm604_vm6 = vcmp.eq.f32.partialorder %v603_v13, 8.507059e+37 }
 0x1b0   : > { %v499_v61 = vmul.f32 2.0, %v475_v54  ;;  %v606_v34 = vor.u32 1.1754944e-38, %v605_v23  ;;  %v537_v26 = vmul.f32 %v1474_v51, %v536_v57 }
 0x1b1   : > { %v1467_v31 = vmul.f32 %v641_v32, %v1452_v52  ;;  %v1470_v6 = vmul.f32 %v639_v35, %v1454_v25  ;;  %v474_v33 = vmax.f32 %v466_v62, 0.0  ;;  %v432_v8 = vpop.xlane.xlu1 %431  ;;  %v610_v35 = vmul.f32 %v1490_v58, %v1423_v3  ;;  %v420_v43 = vpop.xlane.xlu0 %419 }
 0x1b2   : > { %v1509_v2 = vmul.f32 %v592_v39, %v499_v61  ;;  %v460_v47 = vmul.f32 2.0, %v432_v8  ;;  %v607_v44 = vsel %vm604_vm6, %v606_v34, %v602_v30  ;;  %v456_v49 = vmul.f32 2.0, %v420_v43 }
 0x1b3   : > { %1035 = vrsqrt.f32 %v1467_v31  ;;  %v498_v12 = vmul.f32 2.0, %v474_v33  ;;  %v611_v55 = vsub.f32 1.0, %v610_v35  ;;  %v538_v28 = vadd.f32 %v1474_v51, %v537_v26 }
 0x1b4   : > { %1037 = vrsqrt.f32 %v1470_v6  ;;  %v643_v50 = vadd.f32 2.0, %v1509_v2  ;;  %v468_v19 = vsub.f32 %v452_v15, %v460_v47  ;;  %v464_v56 = vsub.f32 %v448_v7, %v456_v49 }
 0x1b5   : > { %v1533_v36 = vmul.f32 %v577_v11, %v498_v12  ;;  %1039 = vrcp.f32 %v1450_v22  ;;  %v545_v39 = vand.u32 2147483648, %v1421_v1  ;;  %v612_v5 = vmul.f32 %v1490_v58, %v611_v55 }
 0x1b6   : > { %v1531_v14 = vmul.f32 %v643_v50, %v1509_v2  ;;  %v476_v32 = vmax.f32 %v468_v19, 0.0  ;;  %v472_v38 = vmax.f32 %v464_v56, 0.0  ;;  %v542_v13 = vsel %vm1583_vm11, %v1474_v51, %v538_v28 }
 0x1b7   : > { %v642_v41 = vadd.f32 2.0, %v1533_v36  ;;  %v618_v1 = vand.u32 2147483647, %v1423_v3  ;;  %v613_v4 = vadd.f32 %v1490_v58, %v612_v5  ;;  %v454_v26 = vadd.f32 %v446_v27, %v1387_v24 }
 0x1b8   : > { %1041 = vrsqrt.f32 %v1531_v14  ;;  %v500_v42 = vmul.f32 2.0, %v476_v32  ;;  %v435_v9 = vpop.xlane.xlu2 %434  ;;  %v496_v23 = vmul.f32 2.0, %v472_v38  ;;  %v633_v49 = vand.u32 2147483647, %v1450_v22 }
 0x1b9   : > { %v1517_v46 = vpop.eup %1035  ;;  %v1557_v53 = vmul.f32 %v642_v41, %v1533_v36  ;;  %v461_v63 = vmul.f32 2.0, %v435_v9  ;;  %vm1612_vm14 = vcmp.eq.f32.partialorder %v618_v1, 8.507059e+37  ;;  %v438_v55 = vpop.xlane.xlu0 %437  ;;  %vm686_vm0 = vcmp.eq.f32.partialorder %v1467_v31, inf }
 0x1ba   : > { %v1522_v48 = vpop.eup %1037  ;;  %v680_v18 = vmul.f32 %v1517_v46, %v1467_v31  ;;  %v1559_v54 = vmul.f32 %v607_v44, %v500_v42  ;;  %vm662_vm2 = vcmp.eq.f32.partialorder %v1470_v6, inf  ;;  %vm664_vm3 = vcmp.eq.f32.partialorder %v1470_v6, 0.0 }
 0x1bb   : > { %v656_v21 = vmul.f32 %v1522_v48, %v1470_v6  ;;  %v1564_v59 = vpop.eup %1039  ;;  %1043 = vrsqrt.f32 %v1557_v53  ;;  %v469_v11 = vsub.f32 %v453_v17, %v461_v63  ;;  %vm688_vm4 = vcmp.eq.f32.partialorder %v1467_v31, 0.0 }
 0x1bc   : > { %v681_v20 = vmul.f32 %v1517_v46, %v680_v18  ;;  %v644_v62 = vadd.f32 2.0, %v1559_v54  ;;  %v625_v47 = vmul.f32 %v1564_v59, %v1450_v22  ;;  %v546_v18 = vor.u32 1.1754944e-38, %v545_v39 }
 0x1bd   : > { %v657_v40 = vmul.f32 %v1522_v48, %v656_v21  ;;  %v620_v21 = vand.u32 2147483648, %v1423_v3  ;;  %v477_v41 = vmax.f32 %v469_v11, 0.0  ;;  %vm630_vm15 = vweird.f32 %v1564_v59 }
 0x1be   : > { %v682_v60 = vmul.f32 0.5, %v681_v20  ;;  %v1042_v61 = vpop.eup %1041  ;;  %v1579_v8 = vmul.f32 %v644_v62, %v1559_v54  ;;  %v547_v51 = vsel %vm1572_vm9, %v546_v18, %v542_v13  ;;  %v617_v3 = vsel %vm1608_vm13, %v1490_v58, %v613_v4  ;;  %vm1655_vm5 = vmor %vm629_vm1, %vm630_vm15 }
 0x1bf   : > { %v658_v16 = vmul.f32 0.5, %v657_v40  ;;  %v704_v0 = vmul.f32 %v1042_v61, %v1531_v14  ;;  %v1603_v35 = vmul.f32 %v547_v51, %v496_v23  ;;  %v626_v40 = vsub.f32 1.0, %v625_v47 }
 0x1c0   : > { %v683_v50 = vsub.f32 1.5, %v682_v60  ;;  %1045 = vrsqrt.f32 %v1579_v8  ;;  %v621_v42 = vor.u32 1.1754944e-38, %v620_v21  ;;  %v501_v60 = vmul.f32 2.0, %v477_v41 }
 0x1c1   : > { %v659_v33 = vsub.f32 1.5, %v658_v16  ;;  %v705_v12 = vmul.f32 %v1042_v61, %v704_v0  ;;  %v1044_v19 = vpop.eup %1043  ;;  %v640_v58 = vadd.f32 2.0, %v1603_v35  ;;  %v627_v56 = vmul.f32 %v1564_v59, %v626_v40 }
 0x1c2   : > { %v692_v30 = vmul.f32 %v1044_v19, %v1557_v53  ;;  %v684_v32 = vmul.f32 %v1517_v46, %v683_v50  ;;  %v622_v45 = vsel %vm1612_vm14, %v621_v42, %v617_v3  ;;  %v462_v39 = vmul.f32 2.0, %v438_v55 }
 0x1c3   : > { %v706_v57 = vmul.f32 0.5, %v705_v12  ;;  %v660_v29 = vmul.f32 %v1522_v48, %v659_v33  ;;  %v1636_v62 = vmul.f32 %v640_v58, %v1603_v35  ;;  %v1640_v10 = vmul.f32 %v622_v45, %v501_v60 }
 0x1c4   : > { %v693_v34 = vmul.f32 %v1044_v19, %v692_v30  ;;  %v685_v9 = vmul.f32 %v684_v32, %v1467_v31  ;;  %v665_v33 = vand.u32 2147483648, %v1470_v6  ;;  %v628_v15 = vadd.f32 %v1564_v59, %v627_v56 }
 0x1c5   : > { %v707_v46 = vsub.f32 1.5, %v706_v57  ;;  %v661_v44 = vmul.f32 %v660_v29, %v1470_v6  ;;  %1047 = vrsqrt.f32 %v1636_v62  ;;  %v470_v50 = vsub.f32 %v454_v26, %v462_v39 }
 0x1c6   : > { %v1621_v43 = vpop.eup %1045  ;;  %v694_v7 = vmul.f32 0.5, %v693_v34  ;;  %v687_v5 = vsel %vm686_vm0, %v1467_v31, %v685_v9  ;;  %v645_v18 = vadd.f32 2.0, %v1640_v10  ;;  %v632_v22 = vsel %vm1655_vm5, %v1564_v59, %v628_v15 }
 0x1c7   : > { %v716_v16 = vmul.f32 %v1621_v43, %v1579_v8  ;;  %v708_v28 = vmul.f32 %v1042_v61, %v707_v46  ;;  %v663_v38 = vsel %vm662_vm2, %v1470_v6, %v661_v44  ;;  %v689_v61 = vand.u32 2147483648, %v1467_v31 }
 0x1c8   : > { %v695_v24 = vsub.f32 1.5, %v694_v7  ;;  %v666_v17 = vsel %vm664_vm3, %v665_v33, %v663_v38  ;;  %vm1662_vm6 = vcmp.eq.f32.partialorder %v633_v49, 8.507059e+37  ;;  %v636_v6 = vor.u32 1.1754944e-38, %v635_v37 }
 0x1c9   : > { %v717_v0 = vmul.f32 %v1621_v43, %v716_v16  ;;  %v709_v47 = vmul.f32 %v708_v28, %v1531_v14  ;;  %v690_v12 = vsel %vm688_vm4, %v689_v61, %v687_v5  ;;  %v1667_v11 = vadd.f32 %v666_v17, %v1454_v25 }
 0x1ca   : > { %v696_v63 = vmul.f32 %v1044_v19, %v695_v24  ;;  %vm710_vm7 = vcmp.eq.f32.partialorder %v1531_v14, inf  ;;  %v713_v19 = vand.u32 2147483648, %v1531_v14  ;;  %v1672_v57 = vmul.f32 %v645_v18, %v1640_v10 }
 0x1cb   : > { %v718_v23 = vmul.f32 0.5, %v717_v0  ;;  %v1048_v4 = vpop.eup %1047  ;;  %v1675_v21 = vadd.f32 %v690_v12, %v1452_v52  ;;  %v711_v59 = vsel %vm710_vm7, %v1531_v14, %v709_v47  ;;  %vm698_vm8 = vcmp.eq.f32.partialorder %v1557_v53, inf }
 0x1cc   : > { %v697_v13 = vmul.f32 %v696_v63, %v1557_v53  ;;  %v478_v27 = vmax.f32 %v470_v50, 0.0  ;;  %v668_v30 = vmul.f32 %v1048_v4, %v1636_v62  ;;  %1049 = vrsqrt.f32 %v1672_v57 }
 0x1cd   : > { %v719_v25 = vsub.f32 1.5, %v718_v23  ;;  %v839_v51 = vlaneseq  ;;  %vm712_vm9 = vcmp.eq.f32.partialorder %v1531_v14, 0.0  ;;  %vm700_vm10 = vcmp.eq.f32.partialorder %v1557_v53, 0.0 }
 0x1ce   : > { %v699_v29 = vsel %vm698_vm8, %v1557_v53, %v697_v13  ;;  %v701_v52 = vand.u32 2147483648, %v1557_v53  ;;  %v759_v32 = vadd.f32 1.0, %v1667_v11  ;;  %v714_v40 = vsel %vm712_vm9, %v713_v19, %v711_v59 }
 0x1cf   : > { %v669_v34 = vmul.f32 %v1048_v4, %v668_v30  ;;  %v502_v20 = vmul.f32 2.0, %v478_v27  ;;  %v777_v48 = vadd.f32 1.0, %v1675_v21  ;;  %v637_v46 = vsel %vm1662_vm6, %v636_v6, %v632_v22 }
 0x1d0   : > { %v702_v41 = vsel %vm700_vm10, %v701_v52, %v699_v29  ;;  %v720_v3 = vmul.f32 %v1621_v43, %v719_v25  ;;  %v1693_v14 = vadd.f32 %v714_v40, %v1509_v2  ;;  %v1695_v44 = vand.u32 127, %v839_v51 }
 0x1d1   : > { %v670_v42 = vmul.f32 0.5, %v669_v34  ;;  %v1690_v26 = vmul.f32 %v637_v46, %v502_v20  ;;  %1051 = vlog2.f32 %v759_v32  ;;  %v1698_v7 = vadd.f32 %v702_v41, %v1533_v36 }
 0x1d2   : > { %v1050_v53 = vpop.eup %1049  ;;  %1053 = vlog2.f32 %v777_v48  ;;  %vm722_vm11 = vcmp.eq.f32.partialorder %v1579_v8, inf  ;;  %v762_v55 = vmul.f32 -0.5, %v1667_v11  ;;  %v721_v2 = vmul.f32 %v720_v3, %v1579_v8 }
 0x1d3   : > { %v671_v49 = vsub.f32 1.5, %v670_v42  ;;  %v728_v37 = vmul.f32 %v1050_v53, %v1672_v57  ;;  %v646_v43 = vadd.f32 2.0, %v1690_v26  ;;  %vm724_vm12 = vcmp.eq.f32.partialorder %v1579_v8, 0.0 }
 0x1d4   : > { %v795_v16 = vadd.f32 1.0, %v1693_v14  ;;  %v725_v36 = vand.u32 2147483648, %v1579_v8  ;;  %v780_v24 = vmul.f32 -0.5, %v1675_v21  ;;  %v765_v45 = vand.u32 2147483647, %v1667_v11 }
 0x1d5   : > { %v672_v9 = vmul.f32 %v1048_v4, %v671_v49  ;;  %v729_v58 = vmul.f32 %v1050_v53, %v728_v37  ;;  %v1709_v56 = vmul.f32 %v646_v43, %v1690_v26  ;;  %v786_v60 = vadd.f32 1.0, %v1698_v7 }
 0x1d6   : > { %vm674_vm13 = vcmp.eq.f32.partialorder %v1636_v62, inf  ;;  %v677_v39 = vand.u32 2147483648, %v1636_v62  ;;  %v763_v0 = vadd.f32 1.0, %v762_v55  ;;  %v723_v5 = vsel %vm722_vm11, %v1579_v8, %v721_v2 }
 0x1d7   : > { %v673_v28 = vmul.f32 %v672_v9, %v1636_v62  ;;  %v730_v38 = vmul.f32 0.5, %v729_v58  ;;  %1055 = vrsqrt.f32 %v1709_v56  ;;  %v1052_v63 = vpop.eup %1051  ;;  %vm676_vm14 = vcmp.eq.f32.partialorder %v1636_v62, 0.0 }
 0x1d8   : > { %v1054_v15 = vpop.eup %1053  ;;  %v783_v61 = vand.u32 2147483647, %v1675_v21  ;;  %1057 = vlog2.f32 %v795_v16  ;;  %v781_v50 = vadd.f32 1.0, %v780_v24  ;;  %vm1724_vm15 = vcmp.lt.f32.partialorder %v765_v45, 0.0004427343 }
 0x1d9   : > { %v675_v33 = vsel %vm674_vm13, %v1636_v62, %v673_v28  ;;  %v731_v47 = vsub.f32 1.5, %v730_v38  ;;  %1059 = vlog2.f32 %v786_v60  ;;  %v761_v23 = vmul.f32 0.6931472, %v1052_v63 }
 0x1da   : > { %v678_v17 = vsel %vm676_vm14, %v677_v39, %v675_v33  ;;  %v798_v18 = vmul.f32 -0.5, %v1693_v14  ;;  %v726_v62 = vsel %vm724_vm12, %v725_v36, %v723_v5  ;;  %v779_v22 = vmul.f32 0.6931472, %v1054_v15 }
 0x1db   : > { %v752_v13 = vadd.f32 %v678_v17, %v1603_v35  ;;  %v732_v1 = vmul.f32 %v1050_v53, %v731_v47  ;;  %v764_v31 = vmul.f32 %v763_v0, %v1667_v11  ;;  %v789_v6 = vmul.f32 -0.5, %v1698_v7 }
 0x1dc   : > { %v801_v59 = vand.u32 2147483647, %v1693_v14  ;;  %vm734_vm0 = vcmp.eq.f32.partialorder %v1672_v57, inf  ;;  %v1738_v35 = vadd.f32 %v726_v62, %v1559_v54  ;;  %v737_v8 = vand.u32 2147483648, %v1672_v57 }
 0x1dd   : > { %v768_v19 = vadd.f32 1.0, %v752_v13  ;;  %v1056_v4 = vpop.eup %1055  ;;  %v771_v27 = vmul.f32 -0.5, %v752_v13  ;;  %v733_v29 = vmul.f32 %v732_v1, %v1672_v57  ;;  %v767_v30 = vsel %vm1724_vm15, %v764_v31, %v761_v23 }
 0x1de   : > { %v740_v25 = vmul.f32 %v1056_v4, %v1709_v56  ;;  %v1058_v11 = vpop.eup %1057  ;;  %v799_v51 = vadd.f32 1.0, %v798_v18  ;;  %vm736_vm2 = vcmp.eq.f32.partialorder %v1672_v57, 0.0  ;;  %v790_v40 = vadd.f32 1.0, %v789_v6 }
 0x1df   : > { %1061 = vlog2.f32 %v768_v19  ;;  %v735_v52 = vsel %vm734_vm0, %v1672_v57, %v733_v29  ;;  %v1060_v32 = vpop.eup %1059  ;;  %v792_v34 = vand.u32 2147483647, %v1698_v7  ;;  %v782_v48 = vmul.f32 %v781_v50, %v1675_v21 }
 0x1e0   : > { %v738_v54 = vsel %vm736_vm2, %v737_v8, %v735_v52  ;;  %v741_v20 = vmul.f32 %v1056_v4, %v740_v25  ;;  %vm1748_vm3 = vcmp.lt.f32.partialorder %v783_v61, 0.0004427343  ;;  %v772_v46 = vadd.f32 1.0, %v771_v27 }
 0x1e1   : > { %v1753_v3 = vadd.f32 %v738_v54, %v1640_v10  ;;  %v797_v42 = vmul.f32 0.6931472, %v1058_v11  ;;  %v804_v53 = vadd.f32 1.0, %v1738_v35  ;;  %v774_v57 = vand.u32 2147483647, %v752_v13 }
 0x1e2   : > { %v742_v49 = vmul.f32 0.5, %v741_v20  ;;  %v785_v37 = vsel %vm1748_vm3, %v782_v48, %v779_v22  ;;  %v841_v43 = vperm.slane %v767_v30, %v1695_v44  ;;  %vm1759_vm1 = vcmp.lt.f32.partialorder %v801_v59, 0.0004427343 }
 0x1e3   : > { %v788_v55 = vmul.f32 0.6931472, %v1060_v32  ;;  %v800_v9 = vmul.f32 %v799_v51, %v1693_v14  ;;  %v791_v10 = vmul.f32 %v790_v40, %v1698_v7  ;;  %vm1765_vm4 = vcmp.lt.f32.partialorder %v792_v34, 0.0004427343 }
 0x1e4   : > { %v743_v36 = vsub.f32 1.5, %v742_v49  ;;  %v807_v58 = vmul.f32 -0.5, %v1738_v35  ;;  %v773_v45 = vmul.f32 %v772_v46, %v752_v13  ;;  %v813_v60 = vadd.f32 1.0, %v1753_v3 }
 0x1e5   : > { %v1062_v2 = vpop.eup %1061  ;;  %1063 = vlog2.f32 %v804_v53  ;;  %vm775_vm5 = vcmp.lt.f32.partialorder %v774_v57, 0.0004427343  ;;  %v803_v39 = vsel %vm1759_vm1, %v800_v9, %v797_v42  ;;  %v794_v7 = vsel %vm1765_vm4, %v791_v10, %v788_v55 }
 0x1e6   : > { %v770_v24 = vmul.f32 0.6931472, %v1062_v2  ;;  %v744_v28 = vmul.f32 %v1056_v4, %v743_v36  ;;  %v843_v38 = vperm.slane %v785_v37, %v1695_v44  ;;  %vm849_vm6 = vcmask 1041409  }
 0x1e7   : > { %vm746_vm7 = vcmp.eq.f32.partialorder %v1709_v56, inf  ;;  %vm851_vm8 = vcmask 1042434   ;;  %1065 = vlog2.f32 %v813_v60  ;;  %vm748_vm9 = vcmp.eq.f32.partialorder %v1709_v56, 0.0 }
 0x1e8   : > { %v776_v14 = vsel %vm775_vm5, %v773_v45, %v770_v24  ;;  %v745_v0 = vmul.f32 %v744_v28, %v1709_v56  ;;  %v749_v5 = vand.u32 2147483648, %v1709_v56  ;;  %vm853_vm10 = vcmask 1043459  }
 0x1e9   : > { %v842_v63 = vperm.slane %v776_v14, %v1695_v44  ;;  %v844_v15 = vperm.slane %v794_v7, %v1695_v44  ;;  %vm855_vm11 = vcmask 1044484   ;;  %v845_v47 = vperm.slane %v803_v39, %v1695_v44 }
 0x1ea   : > { %v747_v33 = vsel %vm746_vm7, %v1709_v56, %v745_v0  ;;  %v816_v13 = vmul.f32 -0.5, %v1753_v3  ;;  %v808_v62 = vadd.f32 1.0, %v807_v58  ;;  %v810_v56 = vand.u32 2147483647, %v1738_v35 }
 0x1eb   : > { %v850_v61 = vsel %vm849_vm6, %v842_v63, %v841_v43  ;;  %v750_v17 = vsel %vm748_vm9, %v749_v5, %v747_v33  ;;  %v1064_v12 = vpop.eup %1063  ;;  %v819_v27 = vand.u32 2147483647, %v1753_v3  ;;  %vm857_vm14 = vcmask 1045509  }
 0x1ec   : > { %v852_v50 = vsel %vm851_vm8, %v843_v38, %v850_v61  ;;  %v758_v23 = vadd.f32 %v750_v17, %v1690_v26  ;;  %v806_v6 = vmul.f32 0.6931472, %v1064_v12  ;;  %v817_v4 = vadd.f32 1.0, %v816_v13 }
 0x1ed   : > { %v854_v18 = vsel %vm853_vm10, %v844_v15, %v852_v50  ;;  %v1066_v31 = vpop.eup %1065  ;;  %v809_v59 = vmul.f32 %v808_v62, %v1738_v35  ;;  %vm811_vm12 = vcmp.lt.f32.partialorder %v810_v56, 0.0004427343  ;;  %vm820_vm13 = vcmp.lt.f32.partialorder %v819_v27, 0.0004427343 }
 0x1ee   : > { %v856_v1 = vsel %vm855_vm11, %v845_v47, %v854_v18  ;;  %v822_v22 = vadd.f32 1.0, %v758_v23  ;;  %v825_v19 = vmul.f32 -0.5, %v758_v23  ;;  %v815_v26 = vmul.f32 0.6931472, %v1066_v31 }
 0x1ef   : > { %v812_v29 = vsel %vm811_vm12, %v809_v59, %v806_v6  ;;  %v818_v25 = vmul.f32 %v817_v4, %v1753_v3  ;;  %v828_v11 = vand.u32 2147483647, %v758_v23  ;;  %vm859_vm0 = vcmask 1046534  }
 0x1f0   : > { %1067 = vlog2.f32 %v822_v22  ;;  %v826_v8 = vadd.f32 1.0, %v825_v19  ;;  %v846_v52 = vperm.slane %v812_v29, %v1695_v44  ;;  %vm861_vm2 = vcmask 1047559  }
 0x1f1   : > { %v821_v51 = vsel %vm820_vm13, %v818_v25, %v815_v26  ;;  %vm829_vm15 = vcmp.lt.f32.partialorder %v828_v11, 0.0004427343  ;;  %vm864_vm3 = vcmask 64512  }
 0x1f2   : > { %v827_v32 = vmul.f32 %v826_v8, %v758_v23  ;;  %v858_v40 = vsel %vm857_vm14, %v846_v52, %v856_v1  ;;  %v847_v54 = vperm.slane %v821_v51, %v1695_v44 }
 0x1f4   : > { %v860_v48 = vsel %vm859_vm0, %v847_v54, %v858_v40 }
 0x1f6   : > { %v1068_v30 = vpop.eup %1067 }
 0x1f7   : > { %v824_v35 = vmul.f32 0.6931472, %v1068_v30 }
 0x1f9   : > { %v830_v34 = vsel %vm829_vm15, %v827_v32, %v824_v35 }
 0x1fa   : > { %v848_v20 = vperm.slane %v830_v34, %v1695_v44 }
 0x1fc   : > { %v862_v41 = vsel %vm861_vm2, %v848_v20, %v860_v48 }
 0x1fd   : > { %v865_v46 = vsel %vm864_vm3, %v862_v41, 0.0 }
 0x1fe   : > { %866 = vst [vmem:[%s164_s16] sm:$0xff] %v865_v46 }
 0x1ff   : > { %1096 = shalt.err (!%p1093_p3)
}
 0x200   : > { %965 = dma.vmem_to_hbm [thread:$0]  (%p1188_p5), %s881_s17, 128, %s883_s19, %s868_s20  }
 0x201 PF: > { %p971_p4 = scmp.ge.s32.totalorder %s1131_s15, 2  ;;  %s894_s4 = sand.u32 1, %s1119_s12  }
 0x202   : > { %s895_s5 = scalar_lea.sflag [#allocation3], %s894_s4 }
 0x203   : > { %p968_p7 = pnand %p971_p4, %p1192_p6 }
 0x205   : > { %p969_p8 = pneg %p968_p7 }
 0x207   : > { %1114 = dma.done.wait (%p969_p8), %s895_s5, 128  }
 0x208   : > { %1116 = vsyncadd (%p969_p8), %s895_s5, 4294967168  ;;  %p13_p9 = scmp.ge.s32.totalorder %s1176_s18, 4   ;;  %s1878_s12 = smov %s1123_s13 }
 0x209   : > { %s1879_s13 = smov %s1127_s14  ;;  %s1880_s14 = smov %s1186_s21 }
 0x20a   : > { %s1881_s15 = smov %s1176_s18  ;;  %15 = sbr.rel (!%p13_p9) target bundleno = 3 (0x3), region = 67 }
 0x20f   :  { %901 = vsyncpa [#allocation3], 1 }
 0x210   :  { %903 = vsyncpa [#allocation3 + $0x1], 1 }

</bundles_post_ra>
